<compile_context>
chip_gen: v7x
topology: tpu7x:2x2x1
jax: 0.10.0
libtpu: 0.0.40
codegen_flags: <defaults>
</compile_context>

<pallas_src>
import functools

import jax
import jax.numpy as jnp
from jax import lax
from jax.experimental import pallas as pl
from jax.experimental.pallas import tpu as pltpu


def _round_up(x, m):
    return (x + m - 1) // m * m


def _tpu_vmem_and_cores():
    """Device-derived VMEM capacity (bytes) and TensorCore count, with safe fallbacks."""
    vmem_cap = 64 * 2 ** 20          # conservative fallback (v7x per-TC VMEM)
    num_cores = 1
    try:
        info = pltpu.get_tpu_info()
    except Exception:
        info = None
    if info is not None:
        v = getattr(info, "vmem_capacity_bytes", None)
        if isinstance(v, int) and v > 0:
            vmem_cap = v
        for attr in ("num_tensor_cores", "tensor_core_count", "num_cores", "core_count"):
            c = getattr(info, attr, None)
            if isinstance(c, int) and c > 0:
                num_cores = c
                break
    return vmem_cap, num_cores


def lstm_recurrent_kernel(gx_ref, wh_hbm_ref, out_ref, cN_ref,
                          wh_vmem, h_sc, c_sc, wh_sem,
                          *, hidden, t_true, masked, compute_dtype, unroll):
    """One grid step processes one (batch block, time block) tile.

    gx_ref    : (TT, BB, 4H)  precomputed x @ Wx + b (compute_dtype; 0.5 pre-folded)
    wh_hbm_ref: (4, H, H)     recurrent weight per gate, left in HBM (pl.ANY)
    out_ref   : (TT, BB, H)   hidden outputs for this tile
    cN_ref    : (1, BB, H)    final cell state for this batch block
    wh_vmem   : (4, H, H)     single-buffered resident copy of Wh
    h_sc, c_sc: (BB, H) f32   recurrent carries (persist across the time axis)
    wh_sem    : DMA semaphore for the one-shot Wh copy
    """
    tb = pl.program_id(1)            # time-block index (sequential, "arbitrary")
    H = hidden
    TT = gx_ref.shape[0]

    @pl.when(tb == 0)
    def _():
        # Copy the time-invariant recurrent weight into VMEM once per batch
        # block (single buffer, never re-DMA'd across the time axis). Start
        # the DMA first so it overlaps the h/c zero-init.
        cp = pltpu.make_async_copy(wh_hbm_ref, wh_vmem, wh_sem)
        cp.start()
        h_sc[...] = jnp.zeros_like(h_sc)
        c_sc[...] = jnp.zeros_like(c_sc)
        cp.wait()

    t0 = tb * TT

    def step(t, carry):
        h, c = carry                                  # f32 (BB, H)
        h_cd = h.astype(compute_dtype)
        gx_t = gx_ref[t]                              # (BB, 4H) compute_dtype
        acts = []
        for k in range(4):                            # per-gate matmul + tanh:
            # MXU work of gate k+1 overlaps the EUP tanh of gate k; live
            # intermediates stay (BB, H) instead of (BB, 4H).
            y = gx_t[:, k * H:(k + 1) * H].astype(jnp.float32) + jnp.dot(
                h_cd, wh_vmem[k], preferred_element_type=jnp.float32)
            tk = jnp.tanh(y)
            # sigmoid(z) == 0.5*tanh(0.5*z)+0.5; the inner 0.5 is already
            # folded into the i/f/o weight/bias columns by the wrapper.
            acts.append(tk if k == 2 else 0.5 * tk + 0.5)
        i, f, g, o = acts
        c_new = c * f + i * g                         # f32 cell-state math
        h_new = jnp.tanh(c_new) * o
        out_ref[t] = h_new.astype(out_ref.dtype)
        if masked:
            # Padded timesteps (t0+t >= T) must not advance the recurrence.
            valid = (t0 + t) < t_true
            h_new = jnp.where(valid, h_new, h)
            c_new = jnp.where(valid, c_new, c)
        return h_new, c_new

    h, c = lax.fori_loop(0, TT, step, (h_sc[...], c_sc[...]), unroll=unroll)
    h_sc[...] = h
    c_sc[...] = c

    @pl.when(tb == pl.num_programs(1) - 1)
    def _():
        cN_ref[0] = c.astype(cN_ref.dtype)


def lstm_q_forward(x, weight, bias, *, time_block=16, batch_block=128,
                   compute_dtype=jnp.bfloat16):
    """x: (T, B, I); weight: (4H, I+H); bias: (4H,). Returns (output, h_n, c_n)."""
    T, B, I = x.shape
    H = weight.shape[0] // 4
    assert weight.shape == (4 * H, I + H)
    dtype = x.dtype
    f32 = jnp.float32

    vmem_cap, num_cores = _tpu_vmem_and_cores()

    # ---- Parameter glue (host-side, one-time) --------------------------------
    w = weight.astype(f32)
    wx = w[:, :I].T                        # (I, 4H)  input  -> gates
    wh = w[:, I:].T                        # (H, 4H)  hidden -> gates
    b = bias.astype(f32)

    # Fold the 0.5 of sigmoid(z) = 0.5*tanh(0.5*z)+0.5 into the i/f/o gate
    # columns (exact power-of-two scale), so the kernel never multiplies y by 0.5.
    gate_scale = jnp.concatenate(
        [jnp.full((H,), 0.5, f32), jnp.full((H,), 0.5, f32),
         jnp.ones((H,), f32), jnp.full((H,), 0.5, f32)])
    wx = wx * gate_scale
    wh = wh * gate_scale
    b = b * gate_scale

    # Per-gate layout (4, H, H), stored in compute_dtype (bf16 halves the
    # resident VMEM footprint and the one-shot HBM copy; f32 accumulation).
    wh4 = jnp.transpose(wh.reshape(H, 4, H), (1, 0, 2)).astype(compute_dtype)

    # ---- Batch padding / blocking --------------------------------------------
    Bp = _round_up(B, 8)                              # f32 sublane multiple
    BB = _round_up(min(batch_block, Bp), 8)
    if num_cores > 1 and Bp > 8:
        # Make sure the "parallel" batch axis has >= num_cores blocks so both
        # v7x TensorCores get work.
        BB = min(BB, _round_up(-(-Bp // num_cores), 8))
    Bp = _round_up(Bp, BB)
    nb = Bp // BB
    xp = x if Bp == B else jnp.pad(x, ((0, 0), (0, Bp - B), (0, 0)))

    # ---- VMEM-aware time blocking --------------------------------------------
    cd_bytes = jnp.dtype(compute_dtype).itemsize
    out_bytes = jnp.dtype(dtype).itemsize
    fixed = (4 * H * H * cd_bytes          # resident Wh scratch (single buffer)
             + 2 * BB * H * 4              # h/c carries (f32)
             + 2 * BB * H * out_bytes)     # c_n block (double buffered)
    per_t = (2 * BB * 4 * H * cd_bytes     # gx block (double buffered)
             + 2 * BB * H * out_bytes)     # output block (double buffered)
    budget = int(0.65 * vmem_cap)
    tt_cap = max(1, (budget - fixed) // per_t) if budget > fixed else 1
    TT = int(max(1, min(time_block, T, tt_cap)))
    Tp = _round_up(T, TT)                  # pad T (masked in-kernel) instead of
    nt = Tp // TT                          # degrading to TT=1 for awkward T.
    masked = Tp != T

    # ---- Hoisted input projection: one parallel GEMM, off the recurrence -----
    gx = xp.reshape(T * Bp, I).astype(f32) @ wx + b
    gx = gx.astype(compute_dtype).reshape(T, Bp, 4 * H)
    if masked:
        gx = jnp.pad(gx, ((0, Tp - T), (0, 0), (0, 0)))

    # Fully unroll the per-tile time loop only for tiny tiles; at GNMT scale a
    # rolled loop avoids code-size / live-range / spill blowup.
    unroll = (BB * 4 * H) <= 16384

    vmem_limit = int(min(0.85 * vmem_cap,
                         max(32 * 2 ** 20, fixed + TT * per_t + (8 << 20))))

    kernel = functools.partial(
        lstm_recurrent_kernel,
        hidden=H, t_true=T, masked=masked,
        compute_dtype=compute_dtype, unroll=unroll)

    grid_spec = pltpu.PrefetchScalarGridSpec(
        num_scalar_prefetch=0,
        grid=(nb, nt),                                           # (batch, time)
        in_specs=[
            pl.BlockSpec((TT, BB, 4 * H), lambda bb, t: (t, bb, 0)),  # gx
            pl.BlockSpec(memory_space=pl.ANY),                        # Wh in HBM
        ],
        out_specs=[
            pl.BlockSpec((TT, BB, H), lambda bb, t: (t, bb, 0)),      # output
            pl.BlockSpec((1, BB, H), lambda bb, t: (0, bb, 0)),       # c_n
        ],
        scratch_shapes=[
            pltpu.VMEM((4, H, H), compute_dtype),   # resident Wh (single buffer)
            pltpu.VMEM((BB, H), jnp.float32),       # h carry
            pltpu.VMEM((BB, H), jnp.float32),       # c carry
            pltpu.SemaphoreType.DMA(()),            # Wh copy semaphore
        ],
    )

    out_shapes = (
        jax.ShapeDtypeStruct((Tp, Bp, H), dtype),
        jax.ShapeDtypeStruct((1, Bp, H), dtype),
    )

    out_full, cN_full = pl.pallas_call(
        kernel,
        out_shape=out_shapes,
        grid_spec=grid_spec,
        compiler_params=pltpu.CompilerParams(
            # Batch blocks are independent (megacore sharding); time is a true
            # recurrence and must stay sequential.
            dimension_semantics=("parallel", "arbitrary"),
            vmem_limit_bytes=vmem_limit,
        ),
    )(gx, wh4)

    output = out_full[:T, :B, :]
    h_n = output[-1:]                  # h_n duplicates output[-1]
    c_n = cN_full[:, :B, :]
    return output, h_n, c_n


def lstm_q_reference(x, weight, bias):
    """Pure-JAX reference mirroring the PyTorch forward (concat + single matmul)."""
    T, B, I = x.shape
    H = weight.shape[0] // 4

    def step(carry, xt):
        h, c = carry
        xc = jnp.concatenate([xt, h], axis=1)
        y = xc @ weight.T + bias
        i, f, g, o = jnp.split(y, 4, axis=1)
        i = jax.nn.sigmoid(i)
        f = jax.nn.sigmoid(f)
        g = jnp.tanh(g)
        o = jax.nn.sigmoid(o)
        c = c * f + i * g
        h = jnp.tanh(c) * o
        return (h, c), h

    h0 = jnp.zeros((B, H), x.dtype)
    (h, c), ys = lax.scan(step, (h0, h0), x)
    return ys, h[None], c[None]


if __name__ == "__main__":
    T, B, I, H = 8, 4, 16, 32

    key = jax.random.PRNGKey(0)
    k_w, k_b, k_x = jax.random.split(key, 3)
    stdv = H ** (-0.5)
    # LSTMCell_q.reset_parameters: uniform(-stdv, stdv) for weight and bias.
    weight = jax.random.uniform(k_w, (4 * H, I + H), jnp.float32, -stdv, stdv)
    bias = jax.random.uniform(k_b, (4 * H,), jnp.float32, -stdv, stdv)
    x = jax.random.normal(k_x, (T, B, I), jnp.float32)

    # 1) Exact f32 compute path: must match the PyTorch bits=32 math tightly.
    out, h_n, c_n = jax.block_until_ready(
        lstm_q_forward(x, weight, bias, compute_dtype=jnp.float32))
    out_ref, h_ref, c_ref = lstm_q_reference(x, weight, bias)
    assert out.shape == (T, B, H) and h_n.shape == (1, B, H) and c_n.shape == (1, B, H)
    assert jnp.allclose(out, out_ref, rtol=1e-4, atol=1e-5)
    assert jnp.allclose(h_n, h_ref, rtol=1e-4, atol=1e-5)
    assert jnp.allclose(c_n, c_ref, rtol=1e-4, atol=1e-5)

    # 2) Default bf16 compute path with an awkward T (exercises time padding +
    #    the in-kernel step masking); looser tolerance for bf16 weights/gx.
    x7 = x[:7]
    out2, h_n2, c_n2 = jax.block_until_ready(
        lstm_q_forward(x7, weight, bias, time_block=4))
    out_ref2, h_ref2, c_ref2 = lstm_q_reference(x7, weight, bias)
    assert out2.shape == (7, B, H) and h_n2.shape == (1, B, H) and c_n2.shape == (1, B, H)
    assert jnp.allclose(out2, out_ref2, rtol=3e-2, atol=3e-2)
    assert jnp.allclose(h_n2, h_ref2, rtol=3e-2, atol=3e-2)
    assert jnp.allclose(c_n2, c_ref2, rtol=3e-2, atol=3e-2)

    print("KERNEL_OK")
</pallas_src>

<mosaic_0001>
module attributes {stable_mosaic.version = 11 : i64} {
  func.func @lstm_recurrent_kernel(%arg0: i32, %arg1: i32, %arg2: memref<8x8x128xf32, #tpu.memory_space<vmem>>, %arg3: memref<4x32x32xf32, #tpu.memory_space<any>>, %arg4: memref<8x8x32xf32, #tpu.memory_space<vmem>>, %arg5: memref<1x8x32xf32, #tpu.memory_space<vmem>>, %arg6: memref<4x32x32xf32, #tpu.memory_space<vmem>>, %arg7: memref<8x32xf32, #tpu.memory_space<vmem>>, %arg8: memref<8x32xf32, #tpu.memory_space<vmem>>, %arg9: memref<!tpu.dma_semaphore, #tpu.memory_space<semaphore_mem>>) attributes {dimension_semantics = [#tpu.dimension_semantics<parallel>, #tpu.dimension_semantics<arbitrary>], iteration_bounds = array<i64: 1, 1>, scalar_prefetch = 0 : i64, scratch_operands = 4 : i64, tpu.core_type = #tpu.core_type<tc>, window_params = [{transform_indices = @transform_0, window_bounds = array<i64: 8, 8, 128>}, {}, {transform_indices = @transform_2, window_bounds = array<i64: 8, 8, 32>}, {transform_indices = @transform_3, window_bounds = array<i64: 1, 8, 32>}]} {
    %c0_i32 = arith.constant 0 : i32
    %0 = arith.cmpi eq, %arg1, %c0_i32 : i32
    %1 = arith.extui %0 : i1 to i32
    %c0_i32_0 = arith.constant 0 : i32
    %2 = arith.cmpi ne, %1, %c0_i32_0 : i32
    scf.if %2 {
      tpu.enqueue_dma source(%arg3 : memref<4x32x32xf32, #tpu.memory_space<any>>) target(%arg6 : memref<4x32x32xf32, #tpu.memory_space<vmem>>) target_semaphore(%arg9 : memref<!tpu.dma_semaphore, #tpu.memory_space<semaphore_mem>>)
      %cst_215 = arith.constant 0.000000e+00 : f32
      %394 = vector.broadcast %cst_215 : f32 to vector<8x32xf32>
      %c0_216 = arith.constant 0 : index
      %c0_217 = arith.constant 0 : index
      %395 = vector.load %arg7[%c0_216, %c0_217] : memref<8x32xf32, #tpu.memory_space<vmem>>, vector<8x32xf32>
      tpu.vector_store %arg7[%c0_216, %c0_217], %394 {strides = array<i32>} : memref<8x32xf32, #tpu.memory_space<vmem>>, vector<8x32xf32>,
      %cst_218 = arith.constant 0.000000e+00 : f32
      %396 = vector.broadcast %cst_218 : f32 to vector<8x32xf32>
      %c0_219 = arith.constant 0 : index
      %c0_220 = arith.constant 0 : index
      %397 = vector.load %arg8[%c0_219, %c0_220] : memref<8x32xf32, #tpu.memory_space<vmem>>, vector<8x32xf32>
      tpu.vector_store %arg8[%c0_219, %c0_220], %396 {strides = array<i32>} : memref<8x32xf32, #tpu.memory_space<vmem>>, vector<8x32xf32>,
      tpu.wait_dma2 semaphore(%arg9 : memref<!tpu.dma_semaphore, #tpu.memory_space<semaphore_mem>>) src(%arg3 : memref<4x32x32xf32, #tpu.memory_space<any>>) dst(%arg6 : memref<4x32x32xf32, #tpu.memory_space<vmem>>)
    } else {
    }
    %c0 = arith.constant 0 : index
    %c0_1 = arith.constant 0 : index
    %3 = vector.load %arg7[%c0, %c0_1] : memref<8x32xf32, #tpu.memory_space<vmem>>, vector<8x32xf32>
    %c0_2 = arith.constant 0 : index
    %c0_3 = arith.constant 0 : index
    %4 = vector.load %arg8[%c0_2, %c0_3] : memref<8x32xf32, #tpu.memory_space<vmem>>, vector<8x32xf32>
    %c0_i32_4 = arith.constant 0 : i32
    %5 = arith.index_cast %c0_i32_4 : i32 to index
    %c0_5 = arith.constant 0 : index
    %c0_6 = arith.constant 0 : index
    %6 = vector.load %arg2[%5, %c0_5, %c0_6] : memref<8x8x128xf32, #tpu.memory_space<vmem>>, vector<1x8x128xf32>
    %7 = vector.shape_cast %6 : vector<1x8x128xf32> to vector<8x128xf32>
    %8 = vector.extract_strided_slice %7 {offsets = [0, 0], sizes = [8, 32], strides = [1, 1]} : vector<8x128xf32> to vector<8x32xf32>
    %c0_7 = arith.constant 0 : index
    %c0_8 = arith.constant 0 : index
    %c0_9 = arith.constant 0 : index
    %9 = vector.load %arg6[%c0_7, %c0_8, %c0_9] : memref<4x32x32xf32, #tpu.memory_space<vmem>>, vector<1x32x32xf32>
    %10 = vector.shape_cast %9 : vector<1x32x32xf32> to vector<32x32xf32>
    %cst = arith.constant dense<0.000000e+00> : vector<8x32xf32>
    %11 = tpu.matmul %3, %10, %cst {dimension_numbers = #tpu.dot_dimension_numbers<[1], [0], [0], [1], [0, 0, 1, 1], [], []>} : vector<8x32xf32>, vector<32x32xf32>, vector<8x32xf32> -> vector<8x32xf32>
    %12 = arith.addf %8, %11 : vector<8x32xf32>
    %13 = math.tanh %12 : vector<8x32xf32>
    %cst_10 = arith.constant 5.000000e-01 : f32
    %14 = vector.broadcast %cst_10 : f32 to vector<8x32xf32>
    %15 = arith.mulf %14, %13 : vector<8x32xf32>
    %cst_11 = arith.constant 5.000000e-01 : f32
    %16 = vector.broadcast %cst_11 : f32 to vector<8x32xf32>
    %17 = arith.addf %15, %16 : vector<8x32xf32>
    %18 = vector.extract_strided_slice %7 {offsets = [0, 32], sizes = [8, 32], strides = [1, 1]} : vector<8x128xf32> to vector<8x32xf32>
    %c1 = arith.constant 1 : index
    %c0_12 = arith.constant 0 : index
    %c0_13 = arith.constant 0 : index
    %19 = vector.load %arg6[%c1, %c0_12, %c0_13] : memref<4x32x32xf32, #tpu.memory_space<vmem>>, vector<1x32x32xf32>
    %20 = vector.shape_cast %19 : vector<1x32x32xf32> to vector<32x32xf32>
    %cst_14 = arith.constant dense<0.000000e+00> : vector<8x32xf32>
    %21 = tpu.matmul %3, %20, %cst_14 {dimension_numbers = #tpu.dot_dimension_numbers<[1], [0], [0], [1], [0, 0, 1, 1], [], []>} : vector<8x32xf32>, vector<32x32xf32>, vector<8x32xf32> -> vector<8x32xf32>
    %22 = arith.addf %18, %21 : vector<8x32xf32>
    %23 = math.tanh %22 : vector<8x32xf32>
    %cst_15 = arith.constant 5.000000e-01 : f32
    %24 = vector.broadcast %cst_15 : f32 to vector<8x32xf32>
    %25 = arith.mulf %24, %23 : vector<8x32xf32>
    %cst_16 = arith.constant 5.000000e-01 : f32
    %26 = vector.broadcast %cst_16 : f32 to vector<8x32xf32>
    %27 = arith.addf %25, %26 : vector<8x32xf32>
    %28 = vector.extract_strided_slice %7 {offsets = [0, 64], sizes = [8, 32], strides = [1, 1]} : vector<8x128xf32> to vector<8x32xf32>
    %c2 = arith.constant 2 : index
    %c0_17 = arith.constant 0 : index
    %c0_18 = arith.constant 0 : index
    %29 = vector.load %arg6[%c2, %c0_17, %c0_18] : memref<4x32x32xf32, #tpu.memory_space<vmem>>, vector<1x32x32xf32>
    %30 = vector.shape_cast %29 : vector<1x32x32xf32> to vector<32x32xf32>
    %cst_19 = arith.constant dense<0.000000e+00> : vector<8x32xf32>
    %31 = tpu.matmul %3, %30, %cst_19 {dimension_numbers = #tpu.dot_dimension_numbers<[1], [0], [0], [1], [0, 0, 1, 1], [], []>} : vector<8x32xf32>, vector<32x32xf32>, vector<8x32xf32> -> vector<8x32xf32>
    %32 = arith.addf %28, %31 : vector<8x32xf32>
    %33 = math.tanh %32 : vector<8x32xf32>
    %34 = vector.extract_strided_slice %7 {offsets = [0, 96], sizes = [8, 32], strides = [1, 1]} : vector<8x128xf32> to vector<8x32xf32>
    %c3 = arith.constant 3 : index
    %c0_20 = arith.constant 0 : index
    %c0_21 = arith.constant 0 : index
    %35 = vector.load %arg6[%c3, %c0_20, %c0_21] : memref<4x32x32xf32, #tpu.memory_space<vmem>>, vector<1x32x32xf32>
    %36 = vector.shape_cast %35 : vector<1x32x32xf32> to vector<32x32xf32>
    %cst_22 = arith.constant dense<0.000000e+00> : vector<8x32xf32>
    %37 = tpu.matmul %3, %36, %cst_22 {dimension_numbers = #tpu.dot_dimension_numbers<[1], [0], [0], [1], [0, 0, 1, 1], [], []>} : vector<8x32xf32>, vector<32x32xf32>, vector<8x32xf32> -> vector<8x32xf32>
    %38 = arith.addf %34, %37 : vector<8x32xf32>
    %39 = math.tanh %38 : vector<8x32xf32>
    %cst_23 = arith.constant 5.000000e-01 : f32
    %40 = vector.broadcast %cst_23 : f32 to vector<8x32xf32>
    %41 = arith.mulf %40, %39 : vector<8x32xf32>
    %cst_24 = arith.constant 5.000000e-01 : f32
    %42 = vector.broadcast %cst_24 : f32 to vector<8x32xf32>
    %43 = arith.addf %41, %42 : vector<8x32xf32>
    %44 = arith.mulf %4, %27 : vector<8x32xf32>
    %45 = arith.mulf %17, %33 : vector<8x32xf32>
    %46 = arith.addf %44, %45 : vector<8x32xf32>
    %47 = math.tanh %46 : vector<8x32xf32>
    %48 = arith.mulf %47, %43 : vector<8x32xf32>
    %49 = arith.index_cast %c0_i32_4 : i32 to index
    %c0_25 = arith.constant 0 : index
    %c0_26 = arith.constant 0 : index
    %50 = vector.load %arg4[%49, %c0_25, %c0_26] : memref<8x8x32xf32, #tpu.memory_space<vmem>>, vector<1x8x32xf32>
    %51 = vector.shape_cast %50 : vector<1x8x32xf32> to vector<8x32xf32>
    %52 = vector.shape_cast %48 : vector<8x32xf32> to vector<1x8x32xf32>
    tpu.vector_store %arg4[%49, %c0_25, %c0_26], %52 {strides = array<i32>} : memref<8x8x32xf32, #tpu.memory_space<vmem>>, vector<1x8x32xf32>,
    %c1_i32 = arith.constant 1 : i32
    %53 = arith.index_cast %c1_i32 : i32 to index
    %c0_27 = arith.constant 0 : index
    %c0_28 = arith.constant 0 : index
    %54 = vector.load %arg2[%53, %c0_27, %c0_28] : memref<8x8x128xf32, #tpu.memory_space<vmem>>, vector<1x8x128xf32>
    %55 = vector.shape_cast %54 : vector<1x8x128xf32> to vector<8x128xf32>
    %56 = vector.extract_strided_slice %55 {offsets = [0, 0], sizes = [8, 32], strides = [1, 1]} : vector<8x128xf32> to vector<8x32xf32>
    %c0_29 = arith.constant 0 : index
    %c0_30 = arith.constant 0 : index
    %c0_31 = arith.constant 0 : index
    %57 = vector.load %arg6[%c0_29, %c0_30, %c0_31] : memref<4x32x32xf32, #tpu.memory_space<vmem>>, vector<1x32x32xf32>
    %58 = vector.shape_cast %57 : vector<1x32x32xf32> to vector<32x32xf32>
    %cst_32 = arith.constant dense<0.000000e+00> : vector<8x32xf32>
    %59 = tpu.matmul %48, %58, %cst_32 {dimension_numbers = #tpu.dot_dimension_numbers<[1], [0], [0], [1], [0, 0, 1, 1], [], []>} : vector<8x32xf32>, vector<32x32xf32>, vector<8x32xf32> -> vector<8x32xf32>
    %60 = arith.addf %56, %59 : vector<8x32xf32>
    %61 = math.tanh %60 : vector<8x32xf32>
    %cst_33 = arith.constant 5.000000e-01 : f32
    %62 = vector.broadcast %cst_33 : f32 to vector<8x32xf32>
    %63 = arith.mulf %62, %61 : vector<8x32xf32>
    %cst_34 = arith.constant 5.000000e-01 : f32
    %64 = vector.broadcast %cst_34 : f32 to vector<8x32xf32>
    %65 = arith.addf %63, %64 : vector<8x32xf32>
    %66 = vector.extract_strided_slice %55 {offsets = [0, 32], sizes = [8, 32], strides = [1, 1]} : vector<8x128xf32> to vector<8x32xf32>
    %c1_35 = arith.constant 1 : index
    %c0_36 = arith.constant 0 : index
    %c0_37 = arith.constant 0 : index
    %67 = vector.load %arg6[%c1_35, %c0_36, %c0_37] : memref<4x32x32xf32, #tpu.memory_space<vmem>>, vector<1x32x32xf32>
    %68 = vector.shape_cast %67 : vector<1x32x32xf32> to vector<32x32xf32>
    %cst_38 = arith.constant dense<0.000000e+00> : vector<8x32xf32>
    %69 = tpu.matmul %48, %68, %cst_38 {dimension_numbers = #tpu.dot_dimension_numbers<[1], [0], [0], [1], [0, 0, 1, 1], [], []>} : vector<8x32xf32>, vector<32x32xf32>, vector<8x32xf32> -> vector<8x32xf32>
    %70 = arith.addf %66, %69 : vector<8x32xf32>
    %71 = math.tanh %70 : vector<8x32xf32>
    %cst_39 = arith.constant 5.000000e-01 : f32
    %72 = vector.broadcast %cst_39 : f32 to vector<8x32xf32>
    %73 = arith.mulf %72, %71 : vector<8x32xf32>
    %cst_40 = arith.constant 5.000000e-01 : f32
    %74 = vector.broadcast %cst_40 : f32 to vector<8x32xf32>
    %75 = arith.addf %73, %74 : vector<8x32xf32>
    %76 = vector.extract_strided_slice %55 {offsets = [0, 64], sizes = [8, 32], strides = [1, 1]} : vector<8x128xf32> to vector<8x32xf32>
    %c2_41 = arith.constant 2 : index
    %c0_42 = arith.constant 0 : index
    %c0_43 = arith.constant 0 : index
    %77 = vector.load %arg6[%c2_41, %c0_42, %c0_43] : memref<4x32x32xf32, #tpu.memory_space<vmem>>, vector<1x32x32xf32>
    %78 = vector.shape_cast %77 : vector<1x32x32xf32> to vector<32x32xf32>
    %cst_44 = arith.constant dense<0.000000e+00> : vector<8x32xf32>
    %79 = tpu.matmul %48, %78, %cst_44 {dimension_numbers = #tpu.dot_dimension_numbers<[1], [0], [0], [1], [0, 0, 1, 1], [], []>} : vector<8x32xf32>, vector<32x32xf32>, vector<8x32xf32> -> vector<8x32xf32>
    %80 = arith.addf %76, %79 : vector<8x32xf32>
    %81 = math.tanh %80 : vector<8x32xf32>
    %82 = vector.extract_strided_slice %55 {offsets = [0, 96], sizes = [8, 32], strides = [1, 1]} : vector<8x128xf32> to vector<8x32xf32>
    %c3_45 = arith.constant 3 : index
    %c0_46 = arith.constant 0 : index
    %c0_47 = arith.constant 0 : index
    %83 = vector.load %arg6[%c3_45, %c0_46, %c0_47] : memref<4x32x32xf32, #tpu.memory_space<vmem>>, vector<1x32x32xf32>
    %84 = vector.shape_cast %83 : vector<1x32x32xf32> to vector<32x32xf32>
    %cst_48 = arith.constant dense<0.000000e+00> : vector<8x32xf32>
    %85 = tpu.matmul %48, %84, %cst_48 {dimension_numbers = #tpu.dot_dimension_numbers<[1], [0], [0], [1], [0, 0, 1, 1], [], []>} : vector<8x32xf32>, vector<32x32xf32>, vector<8x32xf32> -> vector<8x32xf32>
    %86 = arith.addf %82, %85 : vector<8x32xf32>
    %87 = math.tanh %86 : vector<8x32xf32>
    %cst_49 = arith.constant 5.000000e-01 : f32
    %88 = vector.broadcast %cst_49 : f32 to vector<8x32xf32>
    %89 = arith.mulf %88, %87 : vector<8x32xf32>
    %cst_50 = arith.constant 5.000000e-01 : f32
    %90 = vector.broadcast %cst_50 : f32 to vector<8x32xf32>
    %91 = arith.addf %89, %90 : vector<8x32xf32>
    %92 = arith.mulf %46, %75 : vector<8x32xf32>
    %93 = arith.mulf %65, %81 : vector<8x32xf32>
    %94 = arith.addf %92, %93 : vector<8x32xf32>
    %95 = math.tanh %94 : vector<8x32xf32>
    %96 = arith.mulf %95, %91 : vector<8x32xf32>
    %97 = arith.index_cast %c1_i32 : i32 to index
    %c0_51 = arith.constant 0 : index
    %c0_52 = arith.constant 0 : index
    %98 = vector.load %arg4[%97, %c0_51, %c0_52] : memref<8x8x32xf32, #tpu.memory_space<vmem>>, vector<1x8x32xf32>
    %99 = vector.shape_cast %98 : vector<1x8x32xf32> to vector<8x32xf32>
    %100 = vector.shape_cast %96 : vector<8x32xf32> to vector<1x8x32xf32>
    tpu.vector_store %arg4[%97, %c0_51, %c0_52], %100 {strides = array<i32>} : memref<8x8x32xf32, #tpu.memory_space<vmem>>, vector<1x8x32xf32>,
    %c2_i32 = arith.constant 2 : i32
    %101 = arith.index_cast %c2_i32 : i32 to index
    %c0_53 = arith.constant 0 : index
    %c0_54 = arith.constant 0 : index
    %102 = vector.load %arg2[%101, %c0_53, %c0_54] : memref<8x8x128xf32, #tpu.memory_space<vmem>>, vector<1x8x128xf32>
    %103 = vector.shape_cast %102 : vector<1x8x128xf32> to vector<8x128xf32>
    %104 = vector.extract_strided_slice %103 {offsets = [0, 0], sizes = [8, 32], strides = [1, 1]} : vector<8x128xf32> to vector<8x32xf32>
    %c0_55 = arith.constant 0 : index
    %c0_56 = arith.constant 0 : index
    %c0_57 = arith.constant 0 : index
    %105 = vector.load %arg6[%c0_55, %c0_56, %c0_57] : memref<4x32x32xf32, #tpu.memory_space<vmem>>, vector<1x32x32xf32>
    %106 = vector.shape_cast %105 : vector<1x32x32xf32> to vector<32x32xf32>
    %cst_58 = arith.constant dense<0.000000e+00> : vector<8x32xf32>
    %107 = tpu.matmul %96, %106, %cst_58 {dimension_numbers = #tpu.dot_dimension_numbers<[1], [0], [0], [1], [0, 0, 1, 1], [], []>} : vector<8x32xf32>, vector<32x32xf32>, vector<8x32xf32> -> vector<8x32xf32>
    %108 = arith.addf %104, %107 : vector<8x32xf32>
    %109 = math.tanh %108 : vector<8x32xf32>
    %cst_59 = arith.constant 5.000000e-01 : f32
    %110 = vector.broadcast %cst_59 : f32 to vector<8x32xf32>
    %111 = arith.mulf %110, %109 : vector<8x32xf32>
    %cst_60 = arith.constant 5.000000e-01 : f32
    %112 = vector.broadcast %cst_60 : f32 to vector<8x32xf32>
    %113 = arith.addf %111, %112 : vector<8x32xf32>
    %114 = vector.extract_strided_slice %103 {offsets = [0, 32], sizes = [8, 32], strides = [1, 1]} : vector<8x128xf32> to vector<8x32xf32>
    %c1_61 = arith.constant 1 : index
    %c0_62 = arith.constant 0 : index
    %c0_63 = arith.constant 0 : index
    %115 = vector.load %arg6[%c1_61, %c0_62, %c0_63] : memref<4x32x32xf32, #tpu.memory_space<vmem>>, vector<1x32x32xf32>
    %116 = vector.shape_cast %115 : vector<1x32x32xf32> to vector<32x32xf32>
    %cst_64 = arith.constant dense<0.000000e+00> : vector<8x32xf32>
    %117 = tpu.matmul %96, %116, %cst_64 {dimension_numbers = #tpu.dot_dimension_numbers<[1], [0], [0], [1], [0, 0, 1, 1], [], []>} : vector<8x32xf32>, vector<32x32xf32>, vector<8x32xf32> -> vector<8x32xf32>
    %118 = arith.addf %114, %117 : vector<8x32xf32>
    %119 = math.tanh %118 : vector<8x32xf32>
    %cst_65 = arith.constant 5.000000e-01 : f32
    %120 = vector.broadcast %cst_65 : f32 to vector<8x32xf32>
    %121 = arith.mulf %120, %119 : vector<8x32xf32>
    %cst_66 = arith.constant 5.000000e-01 : f32
    %122 = vector.broadcast %cst_66 : f32 to vector<8x32xf32>
    %123 = arith.addf %121, %122 : vector<8x32xf32>
    %124 = vector.extract_strided_slice %103 {offsets = [0, 64], sizes = [8, 32], strides = [1, 1]} : vector<8x128xf32> to vector<8x32xf32>
    %c2_67 = arith.constant 2 : index
    %c0_68 = arith.constant 0 : index
    %c0_69 = arith.constant 0 : index
    %125 = vector.load %arg6[%c2_67, %c0_68, %c0_69] : memref<4x32x32xf32, #tpu.memory_space<vmem>>, vector<1x32x32xf32>
    %126 = vector.shape_cast %125 : vector<1x32x32xf32> to vector<32x32xf32>
    %cst_70 = arith.constant dense<0.000000e+00> : vector<8x32xf32>
    %127 = tpu.matmul %96, %126, %cst_70 {dimension_numbers = #tpu.dot_dimension_numbers<[1], [0], [0], [1], [0, 0, 1, 1], [], []>} : vector<8x32xf32>, vector<32x32xf32>, vector<8x32xf32> -> vector<8x32xf32>
    %128 = arith.addf %124, %127 : vector<8x32xf32>
    %129 = math.tanh %128 : vector<8x32xf32>
    %130 = vector.extract_strided_slice %103 {offsets = [0, 96], sizes = [8, 32], strides = [1, 1]} : vector<8x128xf32> to vector<8x32xf32>
    %c3_71 = arith.constant 3 : index
    %c0_72 = arith.constant 0 : index
    %c0_73 = arith.constant 0 : index
    %131 = vector.load %arg6[%c3_71, %c0_72, %c0_73] : memref<4x32x32xf32, #tpu.memory_space<vmem>>, vector<1x32x32xf32>
    %132 = vector.shape_cast %131 : vector<1x32x32xf32> to vector<32x32xf32>
    %cst_74 = arith.constant dense<0.000000e+00> : vector<8x32xf32>
    %133 = tpu.matmul %96, %132, %cst_74 {dimension_numbers = #tpu.dot_dimension_numbers<[1], [0], [0], [1], [0, 0, 1, 1], [], []>} : vector<8x32xf32>, vector<32x32xf32>, vector<8x32xf32> -> vector<8x32xf32>
    %134 = arith.addf %130, %133 : vector<8x32xf32>
    %135 = math.tanh %134 : vector<8x32xf32>
    %cst_75 = arith.constant 5.000000e-01 : f32
    %136 = vector.broadcast %cst_75 : f32 to vector<8x32xf32>
    %137 = arith.mulf %136, %135 : vector<8x32xf32>
    %cst_76 = arith.constant 5.000000e-01 : f32
    %138 = vector.broadcast %cst_76 : f32 to vector<8x32xf32>
    %139 = arith.addf %137, %138 : vector<8x32xf32>
    %140 = arith.mulf %94, %123 : vector<8x32xf32>
    %141 = arith.mulf %113, %129 : vector<8x32xf32>
    %142 = arith.addf %140, %141 : vector<8x32xf32>
    %143 = math.tanh %142 : vector<8x32xf32>
    %144 = arith.mulf %143, %139 : vector<8x32xf32>
    %145 = arith.index_cast %c2_i32 : i32 to index
    %c0_77 = arith.constant 0 : index
    %c0_78 = arith.constant 0 : index
    %146 = vector.load %arg4[%145, %c0_77, %c0_78] : memref<8x8x32xf32, #tpu.memory_space<vmem>>, vector<1x8x32xf32>
    %147 = vector.shape_cast %146 : vector<1x8x32xf32> to vector<8x32xf32>
    %148 = vector.shape_cast %144 : vector<8x32xf32> to vector<1x8x32xf32>
    tpu.vector_store %arg4[%145, %c0_77, %c0_78], %148 {strides = array<i32>} : memref<8x8x32xf32, #tpu.memory_space<vmem>>, vector<1x8x32xf32>,
    %c3_i32 = arith.constant 3 : i32
    %149 = arith.index_cast %c3_i32 : i32 to index
    %c0_79 = arith.constant 0 : index
    %c0_80 = arith.constant 0 : index
    %150 = vector.load %arg2[%149, %c0_79, %c0_80] : memref<8x8x128xf32, #tpu.memory_space<vmem>>, vector<1x8x128xf32>
    %151 = vector.shape_cast %150 : vector<1x8x128xf32> to vector<8x128xf32>
    %152 = vector.extract_strided_slice %151 {offsets = [0, 0], sizes = [8, 32], strides = [1, 1]} : vector<8x128xf32> to vector<8x32xf32>
    %c0_81 = arith.constant 0 : index
    %c0_82 = arith.constant 0 : index
    %c0_83 = arith.constant 0 : index
    %153 = vector.load %arg6[%c0_81, %c0_82, %c0_83] : memref<4x32x32xf32, #tpu.memory_space<vmem>>, vector<1x32x32xf32>
    %154 = vector.shape_cast %153 : vector<1x32x32xf32> to vector<32x32xf32>
    %cst_84 = arith.constant dense<0.000000e+00> : vector<8x32xf32>
    %155 = tpu.matmul %144, %154, %cst_84 {dimension_numbers = #tpu.dot_dimension_numbers<[1], [0], [0], [1], [0, 0, 1, 1], [], []>} : vector<8x32xf32>, vector<32x32xf32>, vector<8x32xf32> -> vector<8x32xf32>
    %156 = arith.addf %152, %155 : vector<8x32xf32>
    %157 = math.tanh %156 : vector<8x32xf32>
    %cst_85 = arith.constant 5.000000e-01 : f32
    %158 = vector.broadcast %cst_85 : f32 to vector<8x32xf32>
    %159 = arith.mulf %158, %157 : vector<8x32xf32>
    %cst_86 = arith.constant 5.000000e-01 : f32
    %160 = vector.broadcast %cst_86 : f32 to vector<8x32xf32>
    %161 = arith.addf %159, %160 : vector<8x32xf32>
    %162 = vector.extract_strided_slice %151 {offsets = [0, 32], sizes = [8, 32], strides = [1, 1]} : vector<8x128xf32> to vector<8x32xf32>
    %c1_87 = arith.constant 1 : index
    %c0_88 = arith.constant 0 : index
    %c0_89 = arith.constant 0 : index
    %163 = vector.load %arg6[%c1_87, %c0_88, %c0_89] : memref<4x32x32xf32, #tpu.memory_space<vmem>>, vector<1x32x32xf32>
    %164 = vector.shape_cast %163 : vector<1x32x32xf32> to vector<32x32xf32>
    %cst_90 = arith.constant dense<0.000000e+00> : vector<8x32xf32>
    %165 = tpu.matmul %144, %164, %cst_90 {dimension_numbers = #tpu.dot_dimension_numbers<[1], [0], [0], [1], [0, 0, 1, 1], [], []>} : vector<8x32xf32>, vector<32x32xf32>, vector<8x32xf32> -> vector<8x32xf32>
    %166 = arith.addf %162, %165 : vector<8x32xf32>
    %167 = math.tanh %166 : vector<8x32xf32>
    %cst_91 = arith.constant 5.000000e-01 : f32
    %168 = vector.broadcast %cst_91 : f32 to vector<8x32xf32>
    %169 = arith.mulf %168, %167 : vector<8x32xf32>
    %cst_92 = arith.constant 5.000000e-01 : f32
    %170 = vector.broadcast %cst_92 : f32 to vector<8x32xf32>
    %171 = arith.addf %169, %170 : vector<8x32xf32>
    %172 = vector.extract_strided_slice %151 {offsets = [0, 64], sizes = [8, 32], strides = [1, 1]} : vector<8x128xf32> to vector<8x32xf32>
    %c2_93 = arith.constant 2 : index
    %c0_94 = arith.constant 0 : index
    %c0_95 = arith.constant 0 : index
    %173 = vector.load %arg6[%c2_93, %c0_94, %c0_95] : memref<4x32x32xf32, #tpu.memory_space<vmem>>, vector<1x32x32xf32>
    %174 = vector.shape_cast %173 : vector<1x32x32xf32> to vector<32x32xf32>
    %cst_96 = arith.constant dense<0.000000e+00> : vector<8x32xf32>
    %175 = tpu.matmul %144, %174, %cst_96 {dimension_numbers = #tpu.dot_dimension_numbers<[1], [0], [0], [1], [0, 0, 1, 1], [], []>} : vector<8x32xf32>, vector<32x32xf32>, vector<8x32xf32> -> vector<8x32xf32>
    %176 = arith.addf %172, %175 : vector<8x32xf32>
    %177 = math.tanh %176 : vector<8x32xf32>
    %178 = vector.extract_strided_slice %151 {offsets = [0, 96], sizes = [8, 32], strides = [1, 1]} : vector<8x128xf32> to vector<8x32xf32>
    %c3_97 = arith.constant 3 : index
    %c0_98 = arith.constant 0 : index
    %c0_99 = arith.constant 0 : index
    %179 = vector.load %arg6[%c3_97, %c0_98, %c0_99] : memref<4x32x32xf32, #tpu.memory_space<vmem>>, vector<1x32x32xf32>
    %180 = vector.shape_cast %179 : vector<1x32x32xf32> to vector<32x32xf32>
    %cst_100 = arith.constant dense<0.000000e+00> : vector<8x32xf32>
    %181 = tpu.matmul %144, %180, %cst_100 {dimension_numbers = #tpu.dot_dimension_numbers<[1], [0], [0], [1], [0, 0, 1, 1], [], []>} : vector<8x32xf32>, vector<32x32xf32>, vector<8x32xf32> -> vector<8x32xf32>
    %182 = arith.addf %178, %181 : vector<8x32xf32>
    %183 = math.tanh %182 : vector<8x32xf32>
    %cst_101 = arith.constant 5.000000e-01 : f32
    %184 = vector.broadcast %cst_101 : f32 to vector<8x32xf32>
    %185 = arith.mulf %184, %183 : vector<8x32xf32>
    %cst_102 = arith.constant 5.000000e-01 : f32
    %186 = vector.broadcast %cst_102 : f32 to vector<8x32xf32>
    %187 = arith.addf %185, %186 : vector<8x32xf32>
    %188 = arith.mulf %142, %171 : vector<8x32xf32>
    %189 = arith.mulf %161, %177 : vector<8x32xf32>
    %190 = arith.addf %188, %189 : vector<8x32xf32>
    %191 = math.tanh %190 : vector<8x32xf32>
    %192 = arith.mulf %191, %187 : vector<8x32xf32>
    %193 = arith.index_cast %c3_i32 : i32 to index
    %c0_103 = arith.constant 0 : index
    %c0_104 = arith.constant 0 : index
    %194 = vector.load %arg4[%193, %c0_103, %c0_104] : memref<8x8x32xf32, #tpu.memory_space<vmem>>, vector<1x8x32xf32>
    %195 = vector.shape_cast %194 : vector<1x8x32xf32> to vector<8x32xf32>
    %196 = vector.shape_cast %192 : vector<8x32xf32> to vector<1x8x32xf32>
    tpu.vector_store %arg4[%193, %c0_103, %c0_104], %196 {strides = array<i32>} : memref<8x8x32xf32, #tpu.memory_space<vmem>>, vector<1x8x32xf32>,
    %c4_i32 = arith.constant 4 : i32
    %197 = arith.index_cast %c4_i32 : i32 to index
    %c0_105 = arith.constant 0 : index
    %c0_106 = arith.constant 0 : index
    %198 = vector.load %arg2[%197, %c0_105, %c0_106] : memref<8x8x128xf32, #tpu.memory_space<vmem>>, vector<1x8x128xf32>
    %199 = vector.shape_cast %198 : vector<1x8x128xf32> to vector<8x128xf32>
    %200 = vector.extract_strided_slice %199 {offsets = [0, 0], sizes = [8, 32], strides = [1, 1]} : vector<8x128xf32> to vector<8x32xf32>
    %c0_107 = arith.constant 0 : index
    %c0_108 = arith.constant 0 : index
    %c0_109 = arith.constant 0 : index
    %201 = vector.load %arg6[%c0_107, %c0_108, %c0_109] : memref<4x32x32xf32, #tpu.memory_space<vmem>>, vector<1x32x32xf32>
    %202 = vector.shape_cast %201 : vector<1x32x32xf32> to vector<32x32xf32>
    %cst_110 = arith.constant dense<0.000000e+00> : vector<8x32xf32>
    %203 = tpu.matmul %192, %202, %cst_110 {dimension_numbers = #tpu.dot_dimension_numbers<[1], [0], [0], [1], [0, 0, 1, 1], [], []>} : vector<8x32xf32>, vector<32x32xf32>, vector<8x32xf32> -> vector<8x32xf32>
    %204 = arith.addf %200, %203 : vector<8x32xf32>
    %205 = math.tanh %204 : vector<8x32xf32>
    %cst_111 = arith.constant 5.000000e-01 : f32
    %206 = vector.broadcast %cst_111 : f32 to vector<8x32xf32>
    %207 = arith.mulf %206, %205 : vector<8x32xf32>
    %cst_112 = arith.constant 5.000000e-01 : f32
    %208 = vector.broadcast %cst_112 : f32 to vector<8x32xf32>
    %209 = arith.addf %207, %208 : vector<8x32xf32>
    %210 = vector.extract_strided_slice %199 {offsets = [0, 32], sizes = [8, 32], strides = [1, 1]} : vector<8x128xf32> to vector<8x32xf32>
    %c1_113 = arith.constant 1 : index
    %c0_114 = arith.constant 0 : index
    %c0_115 = arith.constant 0 : index
    %211 = vector.load %arg6[%c1_113, %c0_114, %c0_115] : memref<4x32x32xf32, #tpu.memory_space<vmem>>, vector<1x32x32xf32>
    %212 = vector.shape_cast %211 : vector<1x32x32xf32> to vector<32x32xf32>
    %cst_116 = arith.constant dense<0.000000e+00> : vector<8x32xf32>
    %213 = tpu.matmul %192, %212, %cst_116 {dimension_numbers = #tpu.dot_dimension_numbers<[1], [0], [0], [1], [0, 0, 1, 1], [], []>} : vector<8x32xf32>, vector<32x32xf32>, vector<8x32xf32> -> vector<8x32xf32>
    %214 = arith.addf %210, %213 : vector<8x32xf32>
    %215 = math.tanh %214 : vector<8x32xf32>
    %cst_117 = arith.constant 5.000000e-01 : f32
    %216 = vector.broadcast %cst_117 : f32 to vector<8x32xf32>
    %217 = arith.mulf %216, %215 : vector<8x32xf32>
    %cst_118 = arith.constant 5.000000e-01 : f32
    %218 = vector.broadcast %cst_118 : f32 to vector<8x32xf32>
    %219 = arith.addf %217, %218 : vector<8x32xf32>
    %220 = vector.extract_strided_slice %199 {offsets = [0, 64], sizes = [8, 32], strides = [1, 1]} : vector<8x128xf32> to vector<8x32xf32>
    %c2_119 = arith.constant 2 : index
    %c0_120 = arith.constant 0 : index
    %c0_121 = arith.constant 0 : index
    %221 = vector.load %arg6[%c2_119, %c0_120, %c0_121] : memref<4x32x32xf32, #tpu.memory_space<vmem>>, vector<1x32x32xf32>
    %222 = vector.shape_cast %221 : vector<1x32x32xf32> to vector<32x32xf32>
    %cst_122 = arith.constant dense<0.000000e+00> : vector<8x32xf32>
    %223 = tpu.matmul %192, %222, %cst_122 {dimension_numbers = #tpu.dot_dimension_numbers<[1], [0], [0], [1], [0, 0, 1, 1], [], []>} : vector<8x32xf32>, vector<32x32xf32>, vector<8x32xf32> -> vector<8x32xf32>
    %224 = arith.addf %220, %223 : vector<8x32xf32>
    %225 = math.tanh %224 : vector<8x32xf32>
    %226 = vector.extract_strided_slice %199 {offsets = [0, 96], sizes = [8, 32], strides = [1, 1]} : vector<8x128xf32> to vector<8x32xf32>
    %c3_123 = arith.constant 3 : index
    %c0_124 = arith.constant 0 : index
    %c0_125 = arith.constant 0 : index
    %227 = vector.load %arg6[%c3_123, %c0_124, %c0_125] : memref<4x32x32xf32, #tpu.memory_space<vmem>>, vector<1x32x32xf32>
    %228 = vector.shape_cast %227 : vector<1x32x32xf32> to vector<32x32xf32>
    %cst_126 = arith.constant dense<0.000000e+00> : vector<8x32xf32>
    %229 = tpu.matmul %192, %228, %cst_126 {dimension_numbers = #tpu.dot_dimension_numbers<[1], [0], [0], [1], [0, 0, 1, 1], [], []>} : vector<8x32xf32>, vector<32x32xf32>, vector<8x32xf32> -> vector<8x32xf32>
    %230 = arith.addf %226, %229 : vector<8x32xf32>
    %231 = math.tanh %230 : vector<8x32xf32>
    %cst_127 = arith.constant 5.000000e-01 : f32
    %232 = vector.broadcast %cst_127 : f32 to vector<8x32xf32>
    %233 = arith.mulf %232, %231 : vector<8x32xf32>
    %cst_128 = arith.constant 5.000000e-01 : f32
    %234 = vector.broadcast %cst_128 : f32 to vector<8x32xf32>
    %235 = arith.addf %233, %234 : vector<8x32xf32>
    %236 = arith.mulf %190, %219 : vector<8x32xf32>
    %237 = arith.mulf %209, %225 : vector<8x32xf32>
    %238 = arith.addf %236, %237 : vector<8x32xf32>
    %239 = math.tanh %238 : vector<8x32xf32>
    %240 = arith.mulf %239, %235 : vector<8x32xf32>
    %241 = arith.index_cast %c4_i32 : i32 to index
    %c0_129 = arith.constant 0 : index
    %c0_130 = arith.constant 0 : index
    %242 = vector.load %arg4[%241, %c0_129, %c0_130] : memref<8x8x32xf32, #tpu.memory_space<vmem>>, vector<1x8x32xf32>
    %243 = vector.shape_cast %242 : vector<1x8x32xf32> to vector<8x32xf32>
    %244 = vector.shape_cast %240 : vector<8x32xf32> to vector<1x8x32xf32>
    tpu.vector_store %arg4[%241, %c0_129, %c0_130], %244 {strides = array<i32>} : memref<8x8x32xf32, #tpu.memory_space<vmem>>, vector<1x8x32xf32>,
    %c5_i32 = arith.constant 5 : i32
    %245 = arith.index_cast %c5_i32 : i32 to index
    %c0_131 = arith.constant 0 : index
    %c0_132 = arith.constant 0 : index
    %246 = vector.load %arg2[%245, %c0_131, %c0_132] : memref<8x8x128xf32, #tpu.memory_space<vmem>>, vector<1x8x128xf32>
    %247 = vector.shape_cast %246 : vector<1x8x128xf32> to vector<8x128xf32>
    %248 = vector.extract_strided_slice %247 {offsets = [0, 0], sizes = [8, 32], strides = [1, 1]} : vector<8x128xf32> to vector<8x32xf32>
    %c0_133 = arith.constant 0 : index
    %c0_134 = arith.constant 0 : index
    %c0_135 = arith.constant 0 : index
    %249 = vector.load %arg6[%c0_133, %c0_134, %c0_135] : memref<4x32x32xf32, #tpu.memory_space<vmem>>, vector<1x32x32xf32>
    %250 = vector.shape_cast %249 : vector<1x32x32xf32> to vector<32x32xf32>
    %cst_136 = arith.constant dense<0.000000e+00> : vector<8x32xf32>
    %251 = tpu.matmul %240, %250, %cst_136 {dimension_numbers = #tpu.dot_dimension_numbers<[1], [0], [0], [1], [0, 0, 1, 1], [], []>} : vector<8x32xf32>, vector<32x32xf32>, vector<8x32xf32> -> vector<8x32xf32>
    %252 = arith.addf %248, %251 : vector<8x32xf32>
    %253 = math.tanh %252 : vector<8x32xf32>
    %cst_137 = arith.constant 5.000000e-01 : f32
    %254 = vector.broadcast %cst_137 : f32 to vector<8x32xf32>
    %255 = arith.mulf %254, %253 : vector<8x32xf32>
    %cst_138 = arith.constant 5.000000e-01 : f32
    %256 = vector.broadcast %cst_138 : f32 to vector<8x32xf32>
    %257 = arith.addf %255, %256 : vector<8x32xf32>
    %258 = vector.extract_strided_slice %247 {offsets = [0, 32], sizes = [8, 32], strides = [1, 1]} : vector<8x128xf32> to vector<8x32xf32>
    %c1_139 = arith.constant 1 : index
    %c0_140 = arith.constant 0 : index
    %c0_141 = arith.constant 0 : index
    %259 = vector.load %arg6[%c1_139, %c0_140, %c0_141] : memref<4x32x32xf32, #tpu.memory_space<vmem>>, vector<1x32x32xf32>
    %260 = vector.shape_cast %259 : vector<1x32x32xf32> to vector<32x32xf32>
    %cst_142 = arith.constant dense<0.000000e+00> : vector<8x32xf32>
    %261 = tpu.matmul %240, %260, %cst_142 {dimension_numbers = #tpu.dot_dimension_numbers<[1], [0], [0], [1], [0, 0, 1, 1], [], []>} : vector<8x32xf32>, vector<32x32xf32>, vector<8x32xf32> -> vector<8x32xf32>
    %262 = arith.addf %258, %261 : vector<8x32xf32>
    %263 = math.tanh %262 : vector<8x32xf32>
    %cst_143 = arith.constant 5.000000e-01 : f32
    %264 = vector.broadcast %cst_143 : f32 to vector<8x32xf32>
    %265 = arith.mulf %264, %263 : vector<8x32xf32>
    %cst_144 = arith.constant 5.000000e-01 : f32
    %266 = vector.broadcast %cst_144 : f32 to vector<8x32xf32>
    %267 = arith.addf %265, %266 : vector<8x32xf32>
    %268 = vector.extract_strided_slice %247 {offsets = [0, 64], sizes = [8, 32], strides = [1, 1]} : vector<8x128xf32> to vector<8x32xf32>
    %c2_145 = arith.constant 2 : index
    %c0_146 = arith.constant 0 : index
    %c0_147 = arith.constant 0 : index
    %269 = vector.load %arg6[%c2_145, %c0_146, %c0_147] : memref<4x32x32xf32, #tpu.memory_space<vmem>>, vector<1x32x32xf32>
    %270 = vector.shape_cast %269 : vector<1x32x32xf32> to vector<32x32xf32>
    %cst_148 = arith.constant dense<0.000000e+00> : vector<8x32xf32>
    %271 = tpu.matmul %240, %270, %cst_148 {dimension_numbers = #tpu.dot_dimension_numbers<[1], [0], [0], [1], [0, 0, 1, 1], [], []>} : vector<8x32xf32>, vector<32x32xf32>, vector<8x32xf32> -> vector<8x32xf32>
    %272 = arith.addf %268, %271 : vector<8x32xf32>
    %273 = math.tanh %272 : vector<8x32xf32>
    %274 = vector.extract_strided_slice %247 {offsets = [0, 96], sizes = [8, 32], strides = [1, 1]} : vector<8x128xf32> to vector<8x32xf32>
    %c3_149 = arith.constant 3 : index
    %c0_150 = arith.constant 0 : index
    %c0_151 = arith.constant 0 : index
    %275 = vector.load %arg6[%c3_149, %c0_150, %c0_151] : memref<4x32x32xf32, #tpu.memory_space<vmem>>, vector<1x32x32xf32>
    %276 = vector.shape_cast %275 : vector<1x32x32xf32> to vector<32x32xf32>
    %cst_152 = arith.constant dense<0.000000e+00> : vector<8x32xf32>
    %277 = tpu.matmul %240, %276, %cst_152 {dimension_numbers = #tpu.dot_dimension_numbers<[1], [0], [0], [1], [0, 0, 1, 1], [], []>} : vector<8x32xf32>, vector<32x32xf32>, vector<8x32xf32> -> vector<8x32xf32>
    %278 = arith.addf %274, %277 : vector<8x32xf32>
    %279 = math.tanh %278 : vector<8x32xf32>
    %cst_153 = arith.constant 5.000000e-01 : f32
    %280 = vector.broadcast %cst_153 : f32 to vector<8x32xf32>
    %281 = arith.mulf %280, %279 : vector<8x32xf32>
    %cst_154 = arith.constant 5.000000e-01 : f32
    %282 = vector.broadcast %cst_154 : f32 to vector<8x32xf32>
    %283 = arith.addf %281, %282 : vector<8x32xf32>
    %284 = arith.mulf %238, %267 : vector<8x32xf32>
    %285 = arith.mulf %257, %273 : vector<8x32xf32>
    %286 = arith.addf %284, %285 : vector<8x32xf32>
    %287 = math.tanh %286 : vector<8x32xf32>
    %288 = arith.mulf %287, %283 : vector<8x32xf32>
    %289 = arith.index_cast %c5_i32 : i32 to index
    %c0_155 = arith.constant 0 : index
    %c0_156 = arith.constant 0 : index
    %290 = vector.load %arg4[%289, %c0_155, %c0_156] : memref<8x8x32xf32, #tpu.memory_space<vmem>>, vector<1x8x32xf32>
    %291 = vector.shape_cast %290 : vector<1x8x32xf32> to vector<8x32xf32>
    %292 = vector.shape_cast %288 : vector<8x32xf32> to vector<1x8x32xf32>
    tpu.vector_store %arg4[%289, %c0_155, %c0_156], %292 {strides = array<i32>} : memref<8x8x32xf32, #tpu.memory_space<vmem>>, vector<1x8x32xf32>,
    %c6_i32 = arith.constant 6 : i32
    %293 = arith.index_cast %c6_i32 : i32 to index
    %c0_157 = arith.constant 0 : index
    %c0_158 = arith.constant 0 : index
    %294 = vector.load %arg2[%293, %c0_157, %c0_158] : memref<8x8x128xf32, #tpu.memory_space<vmem>>, vector<1x8x128xf32>
    %295 = vector.shape_cast %294 : vector<1x8x128xf32> to vector<8x128xf32>
    %296 = vector.extract_strided_slice %295 {offsets = [0, 0], sizes = [8, 32], strides = [1, 1]} : vector<8x128xf32> to vector<8x32xf32>
    %c0_159 = arith.constant 0 : index
    %c0_160 = arith.constant 0 : index
    %c0_161 = arith.constant 0 : index
    %297 = vector.load %arg6[%c0_159, %c0_160, %c0_161] : memref<4x32x32xf32, #tpu.memory_space<vmem>>, vector<1x32x32xf32>
    %298 = vector.shape_cast %297 : vector<1x32x32xf32> to vector<32x32xf32>
    %cst_162 = arith.constant dense<0.000000e+00> : vector<8x32xf32>
    %299 = tpu.matmul %288, %298, %cst_162 {dimension_numbers = #tpu.dot_dimension_numbers<[1], [0], [0], [1], [0, 0, 1, 1], [], []>} : vector<8x32xf32>, vector<32x32xf32>, vector<8x32xf32> -> vector<8x32xf32>
    %300 = arith.addf %296, %299 : vector<8x32xf32>
    %301 = math.tanh %300 : vector<8x32xf32>
    %cst_163 = arith.constant 5.000000e-01 : f32
    %302 = vector.broadcast %cst_163 : f32 to vector<8x32xf32>
    %303 = arith.mulf %302, %301 : vector<8x32xf32>
    %cst_164 = arith.constant 5.000000e-01 : f32
    %304 = vector.broadcast %cst_164 : f32 to vector<8x32xf32>
    %305 = arith.addf %303, %304 : vector<8x32xf32>
    %306 = vector.extract_strided_slice %295 {offsets = [0, 32], sizes = [8, 32], strides = [1, 1]} : vector<8x128xf32> to vector<8x32xf32>
    %c1_165 = arith.constant 1 : index
    %c0_166 = arith.constant 0 : index
    %c0_167 = arith.constant 0 : index
    %307 = vector.load %arg6[%c1_165, %c0_166, %c0_167] : memref<4x32x32xf32, #tpu.memory_space<vmem>>, vector<1x32x32xf32>
    %308 = vector.shape_cast %307 : vector<1x32x32xf32> to vector<32x32xf32>
    %cst_168 = arith.constant dense<0.000000e+00> : vector<8x32xf32>
    %309 = tpu.matmul %288, %308, %cst_168 {dimension_numbers = #tpu.dot_dimension_numbers<[1], [0], [0], [1], [0, 0, 1, 1], [], []>} : vector<8x32xf32>, vector<32x32xf32>, vector<8x32xf32> -> vector<8x32xf32>
    %310 = arith.addf %306, %309 : vector<8x32xf32>
    %311 = math.tanh %310 : vector<8x32xf32>
    %cst_169 = arith.constant 5.000000e-01 : f32
    %312 = vector.broadcast %cst_169 : f32 to vector<8x32xf32>
    %313 = arith.mulf %312, %311 : vector<8x32xf32>
    %cst_170 = arith.constant 5.000000e-01 : f32
    %314 = vector.broadcast %cst_170 : f32 to vector<8x32xf32>
    %315 = arith.addf %313, %314 : vector<8x32xf32>
    %316 = vector.extract_strided_slice %295 {offsets = [0, 64], sizes = [8, 32], strides = [1, 1]} : vector<8x128xf32> to vector<8x32xf32>
    %c2_171 = arith.constant 2 : index
    %c0_172 = arith.constant 0 : index
    %c0_173 = arith.constant 0 : index
    %317 = vector.load %arg6[%c2_171, %c0_172, %c0_173] : memref<4x32x32xf32, #tpu.memory_space<vmem>>, vector<1x32x32xf32>
    %318 = vector.shape_cast %317 : vector<1x32x32xf32> to vector<32x32xf32>
    %cst_174 = arith.constant dense<0.000000e+00> : vector<8x32xf32>
    %319 = tpu.matmul %288, %318, %cst_174 {dimension_numbers = #tpu.dot_dimension_numbers<[1], [0], [0], [1], [0, 0, 1, 1], [], []>} : vector<8x32xf32>, vector<32x32xf32>, vector<8x32xf32> -> vector<8x32xf32>
    %320 = arith.addf %316, %319 : vector<8x32xf32>
    %321 = math.tanh %320 : vector<8x32xf32>
    %322 = vector.extract_strided_slice %295 {offsets = [0, 96], sizes = [8, 32], strides = [1, 1]} : vector<8x128xf32> to vector<8x32xf32>
    %c3_175 = arith.constant 3 : index
    %c0_176 = arith.constant 0 : index
    %c0_177 = arith.constant 0 : index
    %323 = vector.load %arg6[%c3_175, %c0_176, %c0_177] : memref<4x32x32xf32, #tpu.memory_space<vmem>>, vector<1x32x32xf32>
    %324 = vector.shape_cast %323 : vector<1x32x32xf32> to vector<32x32xf32>
    %cst_178 = arith.constant dense<0.000000e+00> : vector<8x32xf32>
    %325 = tpu.matmul %288, %324, %cst_178 {dimension_numbers = #tpu.dot_dimension_numbers<[1], [0], [0], [1], [0, 0, 1, 1], [], []>} : vector<8x32xf32>, vector<32x32xf32>, vector<8x32xf32> -> vector<8x32xf32>
    %326 = arith.addf %322, %325 : vector<8x32xf32>
    %327 = math.tanh %326 : vector<8x32xf32>
    %cst_179 = arith.constant 5.000000e-01 : f32
    %328 = vector.broadcast %cst_179 : f32 to vector<8x32xf32>
    %329 = arith.mulf %328, %327 : vector<8x32xf32>
    %cst_180 = arith.constant 5.000000e-01 : f32
    %330 = vector.broadcast %cst_180 : f32 to vector<8x32xf32>
    %331 = arith.addf %329, %330 : vector<8x32xf32>
    %332 = arith.mulf %286, %315 : vector<8x32xf32>
    %333 = arith.mulf %305, %321 : vector<8x32xf32>
    %334 = arith.addf %332, %333 : vector<8x32xf32>
    %335 = math.tanh %334 : vector<8x32xf32>
    %336 = arith.mulf %335, %331 : vector<8x32xf32>
    %337 = arith.index_cast %c6_i32 : i32 to index
    %c0_181 = arith.constant 0 : index
    %c0_182 = arith.constant 0 : index
    %338 = vector.load %arg4[%337, %c0_181, %c0_182] : memref<8x8x32xf32, #tpu.memory_space<vmem>>, vector<1x8x32xf32>
    %339 = vector.shape_cast %338 : vector<1x8x32xf32> to vector<8x32xf32>
    %340 = vector.shape_cast %336 : vector<8x32xf32> to vector<1x8x32xf32>
    tpu.vector_store %arg4[%337, %c0_181, %c0_182], %340 {strides = array<i32>} : memref<8x8x32xf32, #tpu.memory_space<vmem>>, vector<1x8x32xf32>,
    %c7_i32 = arith.constant 7 : i32
    %341 = arith.index_cast %c7_i32 : i32 to index
    %c0_183 = arith.constant 0 : index
    %c0_184 = arith.constant 0 : index
    %342 = vector.load %arg2[%341, %c0_183, %c0_184] : memref<8x8x128xf32, #tpu.memory_space<vmem>>, vector<1x8x128xf32>
    %343 = vector.shape_cast %342 : vector<1x8x128xf32> to vector<8x128xf32>
    %344 = vector.extract_strided_slice %343 {offsets = [0, 0], sizes = [8, 32], strides = [1, 1]} : vector<8x128xf32> to vector<8x32xf32>
    %c0_185 = arith.constant 0 : index
    %c0_186 = arith.constant 0 : index
    %c0_187 = arith.constant 0 : index
    %345 = vector.load %arg6[%c0_185, %c0_186, %c0_187] : memref<4x32x32xf32, #tpu.memory_space<vmem>>, vector<1x32x32xf32>
    %346 = vector.shape_cast %345 : vector<1x32x32xf32> to vector<32x32xf32>
    %cst_188 = arith.constant dense<0.000000e+00> : vector<8x32xf32>
    %347 = tpu.matmul %336, %346, %cst_188 {dimension_numbers = #tpu.dot_dimension_numbers<[1], [0], [0], [1], [0, 0, 1, 1], [], []>} : vector<8x32xf32>, vector<32x32xf32>, vector<8x32xf32> -> vector<8x32xf32>
    %348 = arith.addf %344, %347 : vector<8x32xf32>
    %349 = math.tanh %348 : vector<8x32xf32>
    %cst_189 = arith.constant 5.000000e-01 : f32
    %350 = vector.broadcast %cst_189 : f32 to vector<8x32xf32>
    %351 = arith.mulf %350, %349 : vector<8x32xf32>
    %cst_190 = arith.constant 5.000000e-01 : f32
    %352 = vector.broadcast %cst_190 : f32 to vector<8x32xf32>
    %353 = arith.addf %351, %352 : vector<8x32xf32>
    %354 = vector.extract_strided_slice %343 {offsets = [0, 32], sizes = [8, 32], strides = [1, 1]} : vector<8x128xf32> to vector<8x32xf32>
    %c1_191 = arith.constant 1 : index
    %c0_192 = arith.constant 0 : index
    %c0_193 = arith.constant 0 : index
    %355 = vector.load %arg6[%c1_191, %c0_192, %c0_193] : memref<4x32x32xf32, #tpu.memory_space<vmem>>, vector<1x32x32xf32>
    %356 = vector.shape_cast %355 : vector<1x32x32xf32> to vector<32x32xf32>
    %cst_194 = arith.constant dense<0.000000e+00> : vector<8x32xf32>
    %357 = tpu.matmul %336, %356, %cst_194 {dimension_numbers = #tpu.dot_dimension_numbers<[1], [0], [0], [1], [0, 0, 1, 1], [], []>} : vector<8x32xf32>, vector<32x32xf32>, vector<8x32xf32> -> vector<8x32xf32>
    %358 = arith.addf %354, %357 : vector<8x32xf32>
    %359 = math.tanh %358 : vector<8x32xf32>
    %cst_195 = arith.constant 5.000000e-01 : f32
    %360 = vector.broadcast %cst_195 : f32 to vector<8x32xf32>
    %361 = arith.mulf %360, %359 : vector<8x32xf32>
    %cst_196 = arith.constant 5.000000e-01 : f32
    %362 = vector.broadcast %cst_196 : f32 to vector<8x32xf32>
    %363 = arith.addf %361, %362 : vector<8x32xf32>
    %364 = vector.extract_strided_slice %343 {offsets = [0, 64], sizes = [8, 32], strides = [1, 1]} : vector<8x128xf32> to vector<8x32xf32>
    %c2_197 = arith.constant 2 : index
    %c0_198 = arith.constant 0 : index
    %c0_199 = arith.constant 0 : index
    %365 = vector.load %arg6[%c2_197, %c0_198, %c0_199] : memref<4x32x32xf32, #tpu.memory_space<vmem>>, vector<1x32x32xf32>
    %366 = vector.shape_cast %365 : vector<1x32x32xf32> to vector<32x32xf32>
    %cst_200 = arith.constant dense<0.000000e+00> : vector<8x32xf32>
    %367 = tpu.matmul %336, %366, %cst_200 {dimension_numbers = #tpu.dot_dimension_numbers<[1], [0], [0], [1], [0, 0, 1, 1], [], []>} : vector<8x32xf32>, vector<32x32xf32>, vector<8x32xf32> -> vector<8x32xf32>
    %368 = arith.addf %364, %367 : vector<8x32xf32>
    %369 = math.tanh %368 : vector<8x32xf32>
    %370 = vector.extract_strided_slice %343 {offsets = [0, 96], sizes = [8, 32], strides = [1, 1]} : vector<8x128xf32> to vector<8x32xf32>
    %c3_201 = arith.constant 3 : index
    %c0_202 = arith.constant 0 : index
    %c0_203 = arith.constant 0 : index
    %371 = vector.load %arg6[%c3_201, %c0_202, %c0_203] : memref<4x32x32xf32, #tpu.memory_space<vmem>>, vector<1x32x32xf32>
    %372 = vector.shape_cast %371 : vector<1x32x32xf32> to vector<32x32xf32>
    %cst_204 = arith.constant dense<0.000000e+00> : vector<8x32xf32>
    %373 = tpu.matmul %336, %372, %cst_204 {dimension_numbers = #tpu.dot_dimension_numbers<[1], [0], [0], [1], [0, 0, 1, 1], [], []>} : vector<8x32xf32>, vector<32x32xf32>, vector<8x32xf32> -> vector<8x32xf32>
    %374 = arith.addf %370, %373 : vector<8x32xf32>
    %375 = math.tanh %374 : vector<8x32xf32>
    %cst_205 = arith.constant 5.000000e-01 : f32
    %376 = vector.broadcast %cst_205 : f32 to vector<8x32xf32>
    %377 = arith.mulf %376, %375 : vector<8x32xf32>
    %cst_206 = arith.constant 5.000000e-01 : f32
    %378 = vector.broadcast %cst_206 : f32 to vector<8x32xf32>
    %379 = arith.addf %377, %378 : vector<8x32xf32>
    %380 = arith.mulf %334, %363 : vector<8x32xf32>
    %381 = arith.mulf %353, %369 : vector<8x32xf32>
    %382 = arith.addf %380, %381 : vector<8x32xf32>
    %383 = math.tanh %382 : vector<8x32xf32>
    %384 = arith.mulf %383, %379 : vector<8x32xf32>
    %385 = arith.index_cast %c7_i32 : i32 to index
    %c0_207 = arith.constant 0 : index
    %c0_208 = arith.constant 0 : index
    %386 = vector.load %arg4[%385, %c0_207, %c0_208] : memref<8x8x32xf32, #tpu.memory_space<vmem>>, vector<1x8x32xf32>
    %387 = vector.shape_cast %386 : vector<1x8x32xf32> to vector<8x32xf32>
    %388 = vector.shape_cast %384 : vector<8x32xf32> to vector<1x8x32xf32>
    tpu.vector_store %arg4[%385, %c0_207, %c0_208], %388 {strides = array<i32>} : memref<8x8x32xf32, #tpu.memory_space<vmem>>, vector<1x8x32xf32>,
    %c8_i32 = arith.constant 8 : i32
    %c0_209 = arith.constant 0 : index
    %c0_210 = arith.constant 0 : index
    %389 = vector.load %arg7[%c0_209, %c0_210] : memref<8x32xf32, #tpu.memory_space<vmem>>, vector<8x32xf32>
    tpu.vector_store %arg7[%c0_209, %c0_210], %384 {strides = array<i32>} : memref<8x32xf32, #tpu.memory_space<vmem>>, vector<8x32xf32>,
    %c0_211 = arith.constant 0 : index
    %c0_212 = arith.constant 0 : index
    %390 = vector.load %arg8[%c0_211, %c0_212] : memref<8x32xf32, #tpu.memory_space<vmem>>, vector<8x32xf32>
    tpu.vector_store %arg8[%c0_211, %c0_212], %382 {strides = array<i32>} : memref<8x32xf32, #tpu.memory_space<vmem>>, vector<8x32xf32>,
    %c0_i32_213 = arith.constant 0 : i32
    %391 = arith.cmpi eq, %arg1, %c0_i32_213 : i32
    %392 = arith.extui %391 : i1 to i32
    %c0_i32_214 = arith.constant 0 : i32
    %393 = arith.cmpi ne, %392, %c0_i32_214 : i32
    scf.if %393 {
      %c0_215 = arith.constant 0 : index
      %c0_216 = arith.constant 0 : index
      %c0_217 = arith.constant 0 : index
      %394 = vector.load %arg5[%c0_215, %c0_216, %c0_217] : memref<1x8x32xf32, #tpu.memory_space<vmem>>, vector<1x8x32xf32>
      %395 = vector.shape_cast %394 : vector<1x8x32xf32> to vector<8x32xf32>
      %396 = vector.shape_cast %382 : vector<8x32xf32> to vector<1x8x32xf32>
      tpu.vector_store %arg5[%c0_215, %c0_216, %c0_217], %396 {strides = array<i32>} : memref<1x8x32xf32, #tpu.memory_space<vmem>>, vector<1x8x32xf32>,
    } else {
    }
    return
  }
  func.func @transform_0(%arg0: i32, %arg1: i32) -> (i32, i32, i32) {
    %c0_i32 = arith.constant 0 : i32
    %c0_i32_0 = arith.constant 0 : i32
    return %arg1, %arg0, %c0_i32 : i32, i32, i32
  }
  func.func @transform_2(%arg0: i32, %arg1: i32) -> (i32, i32, i32) {
    %c0_i32 = arith.constant 0 : i32
    %c0_i32_0 = arith.constant 0 : i32
    return %arg1, %arg0, %c0_i32 : i32, i32, i32
  }
  func.func @transform_3(%arg0: i32, %arg1: i32) -> (i32, i32, i32) {
    %c0_i32 = arith.constant 0 : i32
    %c0_i32_0 = arith.constant 0 : i32
    %c0_i32_1 = arith.constant 0 : i32
    return %c0_i32, %arg0, %c0_i32_0 : i32, i32, i32
  }
}

</mosaic_0001>

<bundles_post_ra>
// kernel: tpu_custom_call.1
= control target key start
LH: loop header
LB: loop body
LE: loop exit
PB: predicated region body
PF: predicated region fallthrough
CT: control target
= control target key end

     0   :  { %9 = vsyncpa [#allocation7], 0  ;;  %s4206_s0 = inlined_call_operand.hbm [shape: f32[8,8,128], index: 0, kind: input, shape index: {}]   ;;  %s4207_s1 = inlined_call_operand.hbm [shape: f32[4,32,32], index: 1, kind: input, shape index: {}]   ;;  %s4208_s2 = inlined_call_operand.hbm [shape: f32[8,8,32], index: 2, kind: output, shape index: {0}]   ;;  %s4209_s3 = inlined_call_operand.hbm [shape: f32[1,8,32], index: 3, kind: output, shape index: {1}]  }
   0x1   :  { %10 = vsyncpa [#allocation8], 0 }
   0x2   :  { %11 = vsyncpa [#allocation11], 0  ;;  %s3789_s12 = smov [#allocation6]   ;;  %s3693_s16 = scalar_lea.hbm %s4206_s0, 1024 }
   0x3   :  { %s17_s13 = sshll.u32 %s3789_s12, 4  ;;  %p3694_p0 = scmp.ne.s32.totalorder %s4206_s0, %s3693_s16  ;;  %s18_s13 = int_to_ptr.vmem [resolvable:$true] %s17_s13 }
   0x4   :  { %p3697_p1 = scmp.lt.u32.totalorder %s3693_s16, %s4206_s0 }
   0x6   :  { %p3699_p2 = pnand %p3697_p1, %p3694_p0 }
   0x8   :  { %3702 = shalt.err (!%p3699_p2)
}
   0x9   :  { %s3703_s21 = scalar_lea.vmem %s18_s13, 1024  ;;  %p3708_p4 = scmp.lt.s32.totalorder %s18_s13, %s18_s13 }
   0xa   :  { %p3704_p3 = scmp.ne.s32.totalorder %s18_s13, %s3703_s21  ;;  %p3709_p5 = scmp.lt.s32.totalorder %s3703_s21, %s3703_s21 }
   0xc   :  { %p3710_p6 = por %p3709_p5, %p3708_p4 }
   0xe   :  { %p3711_p7 = pnand %p3710_p6, %p3704_p3 }
  0x10   :  { %3714 = shalt.err (!%p3711_p7)
}
  0x11   :  { %s3790_s22 = smov 128   ;;  %s3791_s23 = smov 8  }
  0x12   :  { %23 = dma.hbm_to_vmem [thread:$0]  %s4206_s0, 1024, %s18_s13, [#allocation7], %s3790_s22, %s3790_s22, %s3791_s23  }
  0x13   :  { %3781 = dma.done.wait [#allocation7], 1024  }
  0x14   :  { %3782 = vsyncadd [#allocation7], 4294966272  ;;  %vm42_vm0 = vcmask 261120   ;;  %s3792_s26 = smov [#allocation2]   ;;  %v3793_v0 = vmov 0.0   ;;  %s3715_s30 = scalar_lea.hbm %s4207_s1, 2048 }
  0x15   :  { %s38_s27 = sshll.u32 %s3792_s26, 4  ;;  %43 = vst.msk [vmem:[#allocation3] sm:$0xff] %vm42_vm0, %v3793_v0  ;;  %44 = vst.msk [vmem:[#allocation4] sm:$0xff] %vm42_vm0, %v3793_v0  ;;  %p3716_p8 = scmp.ne.s32.totalorder %s4207_s1, %s3715_s30  ;;  %s39_s27 = int_to_ptr.vmem [resolvable:$true] %s38_s27 }
  0x16   :  { %p3719_p9 = scmp.lt.u32.totalorder %s3715_s30, %s4207_s1 }
  0x18   :  { %p3721_p10 = pnand %p3719_p9, %p3716_p8 }
  0x1a   :  { %3724 = shalt.err (!%p3721_p10)  }
  0x1b   :  { %s3725_s7 = scalar_lea.vmem %s39_s27, 2048  ;;  %p3730_p12 = scmp.lt.s32.totalorder %s39_s27, %s39_s27 }
  0x1c   :  { %p3726_p11 = scmp.ne.s32.totalorder %s39_s27, %s3725_s7  ;;  %p3731_p13 = scmp.lt.s32.totalorder %s3725_s7, %s3725_s7 }
  0x1e   :  { %p3732_p0 = por %p3731_p13, %p3730_p12 }
  0x20   :  { %p3733_p1 = pnand %p3732_p0, %p3726_p11 }
  0x22   :  { %3736 = shalt.err (!%p3733_p1)  }
  0x23   :  { %41 = dma.hbm_to_vmem [thread:$0]  %s4207_s1, 2048, %s39_s27, [#allocation5] }
  0x24   :  { %3783 = dma.done.wait [#allocation5], 2048 }
  0x25   :  { %3784 = vsyncadd [#allocation5], 4294965248  ;;  %v3794_v1 = vmov 0.0|0.0   ;;  %vm3795_vm1 = vmmov 0   ;;  %v52_v2 = vld [vmem:[#allocation2] sm:$0xff]  ;;  %v53_v3 = vld [vmem:[#allocation2 + $0x8] sm:$0xff] }
  0x26   :  { %3409 = vmatprep.subr.bf16.mxu0 %v3794_v1  ;;  %3415 = vmatprep.subr.bf16.mxu1 %v3794_v1  ;;  %v135_v4 = vld [vmem:[#allocation2 + $0x20] sm:$0xff]  ;;  %v3858_v5 = vpack.c.bf16 %v53_v3, %v52_v2  ;;  %v136_v6 = vld [vmem:[#allocation2 + $0x28] sm:$0xff]  ;;  %v54_v7 = vld [vmem:[#allocation2 + $0x10] sm:$0xff]  ;;  %s3796_s1 = smov 32   ;;  %s3797_s10 = smov 64  }
  0x27   :  { %3065 = vmatprep.mubr.msk.f32.mxu0 %vm3795_vm1, %v3793_v0  ;;  %3076 = vmatprep.mubr.msk.f32.mxu1 %vm3795_vm1, %v3793_v0  ;;  %v55_v8 = vld [vmem:[#allocation2 + $0x18] sm:$0xff]  ;;  %v3860_v9 = vpack.c.bf16 %v136_v6, %v135_v4  ;;  %v137_v10 = vld [vmem:[#allocation2 + $0x30] sm:$0xff]  ;;  %v218_v14 = vld [vmem:[#allocation2 + $0x40] sm:$0xff]  ;;  %s3798_s11 = smov 96   ;;  %s3799_s12 = smov [#allocation10]  }
  0x28   :  { %v138_v11 = vld [vmem:[#allocation2 + $0x38] sm:$0xff]  ;;  %3411 = vmatpush3.bf16.msra.mxu0 %v3858_v5  ;;  %v3863_v12 = vpack.c.bf16 %v55_v8, %v54_v7  ;;  %v219_v15 = vld [vmem:[#allocation2 + $0x48] sm:$0xff]  ;;  %v299_v16 = vld [vmem:[#allocation2 + $0x60] sm:$0xff]  ;;  %s2845_s13 = sshll.u32 %s3799_s12, 4  ;;  %s2846_s13 = int_to_ptr.vmem [resolvable:$true] %s2845_s13 }
  0x29   :  { %3412 = vmatprep.subr.bf16.mxu0 %v3794_v1  ;;  %3417 = vmatpush3.bf16.msra.mxu1 %v3860_v9  ;;  %v3867_v13 = vpack.c.bf16 %v138_v11, %v137_v10  ;;  %v300_v17 = vld [vmem:[#allocation2 + $0x68] sm:$0xff]  ;;  %v49_v18 = vld [vmem:[#allocation3] sm:$0xff]  ;;  %v3871_v19 = vpack.c.bf16 %v219_v15, %v218_v14  ;;  %v220_v20 = vld [vmem:[#allocation2 + $0x50] sm:$0xff]  ;;  %s3737_s14 = scalar_lea.vmem %s2846_s13, 128  ;;  %p3742_p3 = scmp.lt.s32.totalorder %s2846_s13, %s2846_s13 }
  0x2a   :  { %3418 = vmatprep.subr.bf16.mxu1 %v3794_v1  ;;  %v221_v21 = vld [vmem:[#allocation2 + $0x58] sm:$0xff]  ;;  %v3876_v22 = vpack.c.bf16 %v300_v17, %v299_v16  ;;  %v301_v23 = vld [vmem:[#allocation2 + $0x70] sm:$0xff]  ;;  %v50_v52 = vld [vmem:[#allocation4] sm:$0xff]  ;;  %p3738_p2 = scmp.ne.s32.totalorder %s2846_s13, %s3737_s14  ;;  %p3743_p4 = scmp.lt.s32.totalorder %s3737_s14, %s3737_s14 }
  0x2b   :  { %v302_v24 = vld [vmem:[#allocation2 + $0x78] sm:$0xff]  ;;  %v3881_v25 = vpack.c.bf16 %v221_v21, %v220_v20  ;;  %v51_v35 = vld [vmem:[#allocation6] sm:$0xff] }
  0x2c   :  { %3414 = vmatpush3.bf16.msra.mxu0 %v3863_v12  ;;  %v3887_v26 = vpack.c.bf16 %v302_v24, %v301_v23  ;;  %v400_v10 = vld [vmem:[#allocation6 + $0x8] sm:$0xff]  ;;  %p3744_p5 = por %p3743_p4, %p3742_p3 }
  0x2d   :  { %3420 = vmatpush3.bf16.msra.mxu1 %v3867_v13  ;;  %3421 = vmatprep.subr.bf16.mxu0 %v3794_v1 }
  0x2e   :  { %3427 = vmatprep.subr.bf16.mxu1 %v3794_v1  ;;  %p3745_p6 = pnand %p3744_p5, %p3738_p2 }
  0x2f   :  { %3066 = vmatmul.mubr.msk.f32.vlgmr.msra.gmra.mrb[0].mxu0 %vm42_vm0, %v49_v18 }
  0x30   :  { %3423 = vmatpush3.bf16.msra.mxu0 %v3871_v19  ;;  %3077 = vmatmul.mubr.msk.f32.vlgmr.msra.gmra.mrb[0].mxu1 %vm42_vm0, %v49_v18 }
  0x31   :  { %3424 = vmatprep.subr.bf16.mxu0 %v3794_v1  ;;  %3087 = vmatprep.mubr.msk.f32.mxu0 %vm3795_vm1, %v3793_v0 }
  0x32   :  { %3429 = vmatpush3.bf16.msra.mxu1 %v3876_v22  ;;  %3098 = vmatprep.mubr.msk.f32.mxu1 %vm3795_vm1, %v3793_v0 }
  0x33   :  { %3430 = vmatprep.subr.bf16.mxu1 %v3794_v1 }
  0x34   :  { %3426 = vmatpush3.bf16.msra.mxu0 %v3881_v25 }
  0x35   :  { %3433 = vmatprep.subr.bf16.mxu0 %v3794_v1 }
  0x36   :  { %3432 = vmatpush3.bf16.msra.mxu1 %v3887_v26 }
  0x37   :  { %3088 = vmatmul.mubr.msk.f32.vlgmr.msra.gmra.mrb[2].mxu0 %vm42_vm0, %v49_v18  ;;  %3439 = vmatprep.subr.bf16.mxu1 %v3794_v1 }
  0x38   :  { %3435 = vmatpush3.bf16.msra.mxu0 %v3858_v5  ;;  %3109 = vmatprep.mubr.msk.f32.mxu0 %vm3795_vm1, %v3793_v0 }
  0x39   :  { %3099 = vmatmul.mubr.msk.f32.vlgmr.msra.gmra.mrb[2].mxu1 %vm42_vm0, %v49_v18  ;;  %3436 = vmatprep.subr.bf16.mxu0 %v3794_v1 }
  0x3a   :  { %3441 = vmatpush3.bf16.msra.mxu1 %v3860_v9  ;;  %3120 = vmatprep.mubr.msk.f32.mxu1 %vm3795_vm1, %v3793_v0 }
  0x3b   :  { %3442 = vmatprep.subr.bf16.mxu1 %v3794_v1 }
  0x3c   :  { %3438 = vmatpush3.bf16.msra.mxu0 %v3863_v12 }
  0x3d   :  { %3445 = vmatprep.subr.bf16.mxu0 %v3794_v1 }
  0x3e   :  { %3444 = vmatpush3.bf16.msra.mxu1 %v3867_v13 }
  0x3f   :  { %3451 = vmatprep.subr.bf16.mxu1 %v3794_v1 }
 0x102   :  { %v126_v27 = vpop.f32.mrb[0].mxu0 }
 0x103   :  { %v3067_v28 = vpop.f32.mrb[1].mxu0  ;;  %v205_v29 = vpop.f32.mrb[0].mxu1  ;;  %v130_v49 = vadd.f32 %v126_v27, %v51_v35 }
 0x104   :  { %v3078_v30 = vpop.f32.mrb[1].mxu1  ;;  %210 = vrot.lane.b32.xlu0 %v205_v29, %s3796_s1 }
 0x10a   :  { %v288_v31 = vpop.f32.mrb[2].mxu0 }
 0x10b   :  { %293 = vrot.lane.b32.xlu0 %v288_v31, %s3797_s10  ;;  %v3089_v32 = vpop.f32.mrb[3].mxu0 }
 0x10c   :  { %v369_v33 = vpop.f32.mrb[2].mxu1 }
 0x10d   :  { %v3100_v34 = vpop.f32.mrb[3].mxu1  ;;  %374 = vrot.lane.b32.xlu1 %v369_v33, %s3798_s11 }
 0x176   :  { %v211_v36 = vpop.permute.xlu0 %210 }
 0x177   :  { %v213_v37 = vadd.f32 %v211_v36, %v51_v35 }
 0x179   :  { %3613 = vtanh.f32 %v213_v37 }
 0x17d   :  { %v294_v38 = vpop.permute.xlu0 %293 }
 0x17e   :  { %v296_v39 = vadd.f32 %v294_v38, %v51_v35 }
 0x17f   :  { %v375_v40 = vpop.permute.xlu1 %374 }
 0x180   :  { %3615 = vtanh.f32 %v296_v39  ;;  %v377_v41 = vadd.f32 %v375_v40, %v51_v35 }
 0x182   :  { %3617 = vtanh.f32 %v377_v41 }
 0x183   :  { %v3614_v42 = vpop.eup %3613  ;;  %3619 = vtanh.f32 %v130_v49 }
 0x184   :  { %v215_v43 = vmul.f32 0.5, %v3614_v42 }
 0x186   :  { %v216_v44 = vadd.f32 0.5, %v215_v43 }
 0x188   :  { %382 = vrot.lane.b32.xlu1 %v216_v44, %s3798_s11 }
 0x18a   :  { %v3616_v45 = vpop.eup %3615 }
 0x18b   :  { %387 = vrot.lane.b32.xlu0 %v3616_v45, %s3797_s10 }
 0x18c   :  { %v3618_v46 = vpop.eup %3617 }
 0x18d   :  { %v379_v47 = vmul.f32 0.5, %v3618_v46  ;;  %v3620_v50 = vpop.eup %3619 }
 0x18e   :  { %v132_v51 = vmul.f32 0.5, %v3620_v50  ;;  %v746_v50 = vld [vmem:[#allocation6 + $0x10] sm:$0xff] }
 0x18f   :  { %v380_v48 = vadd.f32 0.5, %v379_v47 }
 0x190   :  { %v133_v55 = vadd.f32 0.5, %v132_v51 }
 0x191   :  { %394 = vrot.lane.b32.xlu1 %v380_v48, %s3796_s1 }
 0x1fa   :  { %v383_v53 = vpop.permute.xlu1 %382 }
 0x1fb   :  { %v385_v54 = vmul.f32 %v383_v53, %v50_v52 }
 0x1fd   :  { %v388_v56 = vpop.permute.xlu0 %387 }
 0x1fe   :  { %v390_v57 = vmul.f32 %v388_v56, %v133_v55 }
 0x200   :  { %v3916_v58 = vadd.f32 %v390_v57, %v385_v54 }
 0x202   :  { %3621 = vtanh.f32 %v3916_v58 }
 0x203   :  { %v395_v59 = vpop.permute.xlu1 %394 }
 0x20c   :  { %v3622_v60 = vpop.eup %3621 }
 0x20d   :  { %v397_v61 = vmul.f32 %v3622_v60, %v395_v59 }
 0x20f   :  { %398 = vst.msk [vmem:[#allocation9] sm:$0xff] %vm42_vm0, %v397_v61  ;;  %3110 = vmatmul.mubr.msk.f32.vlgmr.msra.gmra.mrb[4].mxu0 %vm42_vm0, %v397_v61  ;;  %3121 = vmatmul.mubr.msk.f32.vlgmr.msra.gmra.mrb[4].mxu1 %vm42_vm0, %v397_v61 }
 0x210   :  { %3447 = vmatpush3.bf16.msra.mxu0 %v3871_v19  ;;  %3453 = vmatpush3.bf16.msra.mxu1 %v3876_v22 }
 0x211   :  { %3448 = vmatprep.subr.bf16.mxu0 %v3794_v1  ;;  %3454 = vmatprep.subr.bf16.mxu1 %v3794_v1 }
 0x212   :  { %3131 = vmatprep.mubr.msk.f32.mxu0 %vm3795_vm1, %v3793_v0  ;;  %3142 = vmatprep.mubr.msk.f32.mxu1 %vm3795_vm1, %v3793_v0 }
 0x214   :  { %3450 = vmatpush3.bf16.msra.mxu0 %v3881_v25  ;;  %3456 = vmatpush3.bf16.msra.mxu1 %v3887_v26 }
 0x215   :  { %3457 = vmatprep.subr.bf16.mxu0 %v3794_v1  ;;  %3463 = vmatprep.subr.bf16.mxu1 %v3794_v1 }
 0x217   :  { %3132 = vmatmul.mubr.msk.f32.vlgmr.msra.gmra.mrb[6].mxu0 %vm42_vm0, %v397_v61  ;;  %3143 = vmatmul.mubr.msk.f32.vlgmr.msra.gmra.mrb[6].mxu1 %vm42_vm0, %v397_v61 }
 0x218   :  { %3459 = vmatpush3.bf16.msra.mxu0 %v3858_v5  ;;  %3465 = vmatpush3.bf16.msra.mxu1 %v3860_v9 }
 0x219   :  { %3460 = vmatprep.subr.bf16.mxu0 %v3794_v1  ;;  %3466 = vmatprep.subr.bf16.mxu1 %v3794_v1 }
 0x21a   :  { %3153 = vmatprep.mubr.msk.f32.mxu0 %vm3795_vm1, %v3793_v0  ;;  %3164 = vmatprep.mubr.msk.f32.mxu1 %vm3795_vm1, %v3793_v0 }
 0x21c   :  { %3462 = vmatpush3.bf16.msra.mxu0 %v3863_v12  ;;  %3468 = vmatpush3.bf16.msra.mxu1 %v3867_v13 }
 0x21d   :  { %3469 = vmatprep.subr.bf16.mxu0 %v3794_v1  ;;  %3475 = vmatprep.subr.bf16.mxu1 %v3794_v1 }
 0x2e2   :  { %v474_v62 = vpop.f32.mrb[4].mxu0  ;;  %v552_v63 = vpop.f32.mrb[4].mxu1 }
 0x2e3   :  { %557 = vrot.lane.b32.xlu0 %v552_v63, %s3796_s1  ;;  %v3111_v2 = vpop.f32.mrb[5].mxu0  ;;  %v3122_v3 = vpop.f32.mrb[5].mxu1  ;;  %v478_v30 = vadd.f32 %v474_v62, %v400_v10 }
 0x2ea   :  { %v634_v4 = vpop.f32.mrb[6].mxu0  ;;  %v714_v6 = vpop.f32.mrb[6].mxu1 }
 0x2eb   :  { %719 = vrot.lane.b32.xlu0 %v714_v6, %s3798_s11  ;;  %v3144_v7 = vpop.f32.mrb[7].mxu1  ;;  %639 = vrot.lane.b32.xlu1 %v634_v4, %s3797_s10  ;;  %v3133_v8 = vpop.f32.mrb[7].mxu0 }
 0x355   :  { %v558_v11 = vpop.permute.xlu0 %557 }
 0x356   :  { %v560_v14 = vadd.f32 %v558_v11, %v400_v10 }
 0x358   :  { %3623 = vtanh.f32 %v560_v14 }
 0x35d   :  { %v720_v15 = vpop.permute.xlu0 %719  ;;  %v640_v16 = vpop.permute.xlu1 %639 }
 0x35e   :  { %v722_v17 = vadd.f32 %v720_v15, %v400_v10  ;;  %v642_v18 = vadd.f32 %v640_v16, %v400_v10 }
 0x360   :  { %3625 = vtanh.f32 %v722_v17 }
 0x361   :  { %3627 = vtanh.f32 %v642_v18 }
 0x362   :  { %v3624_v20 = vpop.eup %3623  ;;  %3629 = vtanh.f32 %v478_v30  ;;  %v1092_v30 = vld [vmem:[#allocation6 + $0x18] sm:$0xff] }
 0x363   :  { %v562_v21 = vmul.f32 0.5, %v3624_v20 }
 0x365   :  { %v563_v23 = vadd.f32 0.5, %v562_v21 }
 0x367   :  { %727 = vrot.lane.b32.xlu1 %v563_v23, %s3798_s11 }
 0x36a   :  { %v3626_v24 = vpop.eup %3625 }
 0x36b   :  { %v3628_v27 = vpop.eup %3627  ;;  %v724_v28 = vmul.f32 0.5, %v3626_v24 }
 0x36c   :  { %732 = vrot.lane.b32.xlu0 %v3628_v27, %s3797_s10  ;;  %v3630_v31 = vpop.eup %3629 }
 0x36d   :  { %v725_v29 = vadd.f32 0.5, %v724_v28  ;;  %v480_v32 = vmul.f32 0.5, %v3630_v31 }
 0x36f   :  { %739 = vrot.lane.b32.xlu1 %v725_v29, %s3796_s1  ;;  %v481_v34 = vadd.f32 0.5, %v480_v32 }
 0x3d9   :  { %v728_v33 = vpop.permute.xlu1 %727 }
 0x3da   :  { %v730_v36 = vmul.f32 %v728_v33, %v3916_v58 }
 0x3de   :  { %v733_v35 = vpop.permute.xlu0 %732 }
 0x3df   :  { %v735_v37 = vmul.f32 %v733_v35, %v481_v34 }
 0x3e1   :  { %v3955_v38 = vadd.f32 %v735_v37, %v730_v36  ;;  %v740_v40 = vpop.permute.xlu1 %739 }
 0x3e3   :  { %3631 = vtanh.f32 %v3955_v38 }
 0x3ed   :  { %v3632_v39 = vpop.eup %3631 }
 0x3ee   :  { %v742_v41 = vmul.f32 %v3632_v39, %v740_v40 }
 0x3f0   :  { %744 = vst.msk [vmem:[#allocation9 + $0x8] sm:$0xff] %vm42_vm0, %v742_v41  ;;  %3154 = vmatmul.mubr.msk.f32.vlgmr.msra.gmra.mrb[8].mxu0 %vm42_vm0, %v742_v41  ;;  %3165 = vmatmul.mubr.msk.f32.vlgmr.msra.gmra.mrb[8].mxu1 %vm42_vm0, %v742_v41 }
 0x3f1   :  { %3471 = vmatpush3.bf16.msra.mxu0 %v3871_v19  ;;  %3477 = vmatpush3.bf16.msra.mxu1 %v3876_v22 }
 0x3f2   :  { %3472 = vmatprep.subr.bf16.mxu0 %v3794_v1  ;;  %3478 = vmatprep.subr.bf16.mxu1 %v3794_v1 }
 0x3f3   :  { %3175 = vmatprep.mubr.msk.f32.mxu0 %vm3795_vm1, %v3793_v0  ;;  %3186 = vmatprep.mubr.msk.f32.mxu1 %vm3795_vm1, %v3793_v0 }
 0x3f5   :  { %3474 = vmatpush3.bf16.msra.mxu0 %v3881_v25  ;;  %3480 = vmatpush3.bf16.msra.mxu1 %v3887_v26 }
 0x3f6   :  { %3481 = vmatprep.subr.bf16.mxu0 %v3794_v1  ;;  %3487 = vmatprep.subr.bf16.mxu1 %v3794_v1 }
 0x3f8   :  { %3176 = vmatmul.mubr.msk.f32.vlgmr.msra.gmra.mrb[10].mxu0 %vm42_vm0, %v742_v41  ;;  %3187 = vmatmul.mubr.msk.f32.vlgmr.msra.gmra.mrb[10].mxu1 %vm42_vm0, %v742_v41 }
 0x3f9   :  { %3483 = vmatpush3.bf16.msra.mxu0 %v3858_v5  ;;  %3489 = vmatpush3.bf16.msra.mxu1 %v3860_v9 }
 0x3fa   :  { %3484 = vmatprep.subr.bf16.mxu0 %v3794_v1  ;;  %3490 = vmatprep.subr.bf16.mxu1 %v3794_v1 }
 0x3fb   :  { %3197 = vmatprep.mubr.msk.f32.mxu0 %vm3795_vm1, %v3793_v0  ;;  %3208 = vmatprep.mubr.msk.f32.mxu1 %vm3795_vm1, %v3793_v0 }
 0x3fd   :  { %3486 = vmatpush3.bf16.msra.mxu0 %v3863_v12  ;;  %3492 = vmatpush3.bf16.msra.mxu1 %v3867_v13 }
 0x3fe   :  { %3493 = vmatprep.subr.bf16.mxu0 %v3794_v1  ;;  %3499 = vmatprep.subr.bf16.mxu1 %v3794_v1 }
 0x4c3   :  { %v820_v42 = vpop.f32.mrb[8].mxu0  ;;  %v898_v43 = vpop.f32.mrb[8].mxu1 }
 0x4c4   :  { %903 = vrot.lane.b32.xlu0 %v898_v43, %s3796_s1  ;;  %v3155_v44 = vpop.f32.mrb[9].mxu0  ;;  %v3166_v45 = vpop.f32.mrb[9].mxu1  ;;  %v824_v2 = vadd.f32 %v820_v42, %v746_v50 }
 0x4cb   :  { %v980_v46 = vpop.f32.mrb[10].mxu0  ;;  %v1060_v47 = vpop.f32.mrb[10].mxu1 }
 0x4cc   :  { %1065 = vrot.lane.b32.xlu0 %v1060_v47, %s3798_s11  ;;  %v3188_v48 = vpop.f32.mrb[11].mxu1  ;;  %985 = vrot.lane.b32.xlu1 %v980_v46, %s3797_s10  ;;  %v3177_v49 = vpop.f32.mrb[11].mxu0 }
 0x536   :  { %v904_v51 = vpop.permute.xlu0 %903 }
 0x537   :  { %v906_v52 = vadd.f32 %v904_v51, %v746_v50 }
 0x539   :  { %3633 = vtanh.f32 %v906_v52 }
 0x53e   :  { %v1066_v53 = vpop.permute.xlu0 %1065  ;;  %v986_v54 = vpop.permute.xlu1 %985 }
 0x53f   :  { %v1068_v55 = vadd.f32 %v1066_v53, %v746_v50  ;;  %v988_v56 = vadd.f32 %v986_v54, %v746_v50 }
 0x541   :  { %3635 = vtanh.f32 %v1068_v55 }
 0x542   :  { %3637 = vtanh.f32 %v988_v56 }
 0x543   :  { %v3634_v57 = vpop.eup %3633  ;;  %3639 = vtanh.f32 %v824_v2 }
 0x544   :  { %v908_v58 = vmul.f32 0.5, %v3634_v57 }
 0x546   :  { %v909_v59 = vadd.f32 0.5, %v908_v58 }
 0x548   :  { %1073 = vrot.lane.b32.xlu1 %v909_v59, %s3798_s11 }
 0x54b   :  { %v3636_v60 = vpop.eup %3635 }
 0x54c   :  { %v3638_v61 = vpop.eup %3637  ;;  %v1070_v62 = vmul.f32 0.5, %v3636_v60 }
 0x54d   :  { %1078 = vrot.lane.b32.xlu0 %v3638_v61, %s3797_s10  ;;  %v3640_v3 = vpop.eup %3639  ;;  %v1438_v61 = vld [vmem:[#allocation6 + $0x20] sm:$0xff] }
 0x54e   :  { %v1071_v63 = vadd.f32 0.5, %v1070_v62  ;;  %v826_v4 = vmul.f32 0.5, %v3640_v3 }
 0x550   :  { %1085 = vrot.lane.b32.xlu1 %v1071_v63, %s3796_s1  ;;  %v827_v7 = vadd.f32 0.5, %v826_v4 }
 0x5ba   :  { %v1074_v6 = vpop.permute.xlu1 %1073 }
 0x5bb   :  { %v1076_v10 = vmul.f32 %v1074_v6, %v3955_v38 }
 0x5bf   :  { %v1079_v8 = vpop.permute.xlu0 %1078 }
 0x5c0   :  { %v1081_v11 = vmul.f32 %v1079_v8, %v827_v7 }
 0x5c2   :  { %v3994_v14 = vadd.f32 %v1081_v11, %v1076_v10  ;;  %v1086_v16 = vpop.permute.xlu1 %1085 }
 0x5c4   :  { %3641 = vtanh.f32 %v3994_v14 }
 0x5ce   :  { %v3642_v15 = vpop.eup %3641 }
 0x5cf   :  { %v1088_v17 = vmul.f32 %v3642_v15, %v1086_v16 }
 0x5d1   :  { %1090 = vst.msk [vmem:[#allocation9 + $0x10] sm:$0xff] %vm42_vm0, %v1088_v17  ;;  %3198 = vmatmul.mubr.msk.f32.vlgmr.msra.gmra.mrb[12].mxu0 %vm42_vm0, %v1088_v17  ;;  %3209 = vmatmul.mubr.msk.f32.vlgmr.msra.gmra.mrb[12].mxu1 %vm42_vm0, %v1088_v17 }
 0x5d2   :  { %3495 = vmatpush3.bf16.msra.mxu0 %v3871_v19  ;;  %3501 = vmatpush3.bf16.msra.mxu1 %v3876_v22 }
 0x5d3   :  { %3496 = vmatprep.subr.bf16.mxu0 %v3794_v1  ;;  %3502 = vmatprep.subr.bf16.mxu1 %v3794_v1 }
 0x5d4   :  { %3219 = vmatprep.mubr.msk.f32.mxu0 %vm3795_vm1, %v3793_v0  ;;  %3230 = vmatprep.mubr.msk.f32.mxu1 %vm3795_vm1, %v3793_v0 }
 0x5d6   :  { %3498 = vmatpush3.bf16.msra.mxu0 %v3881_v25  ;;  %3504 = vmatpush3.bf16.msra.mxu1 %v3887_v26 }
 0x5d7   :  { %3505 = vmatprep.subr.bf16.mxu0 %v3794_v1  ;;  %3511 = vmatprep.subr.bf16.mxu1 %v3794_v1 }
 0x5d9   :  { %3220 = vmatmul.mubr.msk.f32.vlgmr.msra.gmra.mrb[14].mxu0 %vm42_vm0, %v1088_v17  ;;  %3231 = vmatmul.mubr.msk.f32.vlgmr.msra.gmra.mrb[14].mxu1 %vm42_vm0, %v1088_v17 }
 0x5da   :  { %3507 = vmatpush3.bf16.msra.mxu0 %v3858_v5  ;;  %3513 = vmatpush3.bf16.msra.mxu1 %v3860_v9 }
 0x5db   :  { %3508 = vmatprep.subr.bf16.mxu0 %v3794_v1  ;;  %3514 = vmatprep.subr.bf16.mxu1 %v3794_v1 }
 0x5dc   :  { %3241 = vmatprep.mubr.msk.f32.mxu0 %vm3795_vm1, %v3793_v0  ;;  %3252 = vmatprep.mubr.msk.f32.mxu1 %vm3795_vm1, %v3793_v0 }
 0x5de   :  { %3510 = vmatpush3.bf16.msra.mxu0 %v3863_v12  ;;  %3516 = vmatpush3.bf16.msra.mxu1 %v3867_v13 }
 0x5df   :  { %3517 = vmatprep.subr.bf16.mxu0 %v3794_v1  ;;  %3523 = vmatprep.subr.bf16.mxu1 %v3794_v1 }
 0x6a4   :  { %v1166_v18 = vpop.f32.mrb[12].mxu0  ;;  %v1244_v20 = vpop.f32.mrb[12].mxu1 }
 0x6a5   :  { %1249 = vrot.lane.b32.xlu0 %v1244_v20, %s3796_s1  ;;  %v3199_v21 = vpop.f32.mrb[13].mxu0  ;;  %v3210_v23 = vpop.f32.mrb[13].mxu1  ;;  %v1170_v44 = vadd.f32 %v1166_v18, %v1092_v30 }
 0x6ac   :  { %v1326_v24 = vpop.f32.mrb[14].mxu0  ;;  %v1406_v27 = vpop.f32.mrb[14].mxu1 }
 0x6ad   :  { %1411 = vrot.lane.b32.xlu0 %v1406_v27, %s3798_s11  ;;  %v3232_v28 = vpop.f32.mrb[15].mxu1  ;;  %1331 = vrot.lane.b32.xlu1 %v1326_v24, %s3797_s10  ;;  %v3221_v29 = vpop.f32.mrb[15].mxu0 }
 0x717   :  { %v1250_v31 = vpop.permute.xlu0 %1249 }
 0x718   :  { %v1252_v32 = vadd.f32 %v1250_v31, %v1092_v30 }
 0x71a   :  { %3643 = vtanh.f32 %v1252_v32 }
 0x71f   :  { %v1412_v33 = vpop.permute.xlu0 %1411  ;;  %v1332_v34 = vpop.permute.xlu1 %1331 }
 0x720   :  { %v1414_v35 = vadd.f32 %v1412_v33, %v1092_v30  ;;  %v1334_v36 = vadd.f32 %v1332_v34, %v1092_v30 }
 0x722   :  { %3645 = vtanh.f32 %v1414_v35 }
 0x723   :  { %3647 = vtanh.f32 %v1334_v36  ;;  %v1784_v36 = vld [vmem:[#allocation6 + $0x28] sm:$0xff] }
 0x724   :  { %v3644_v37 = vpop.eup %3643  ;;  %3649 = vtanh.f32 %v1170_v44 }
 0x725   :  { %v1254_v38 = vmul.f32 0.5, %v3644_v37 }
 0x727   :  { %v1255_v39 = vadd.f32 0.5, %v1254_v38 }
 0x729   :  { %1419 = vrot.lane.b32.xlu1 %v1255_v39, %s3798_s11 }
 0x72c   :  { %v3646_v40 = vpop.eup %3645 }
 0x72d   :  { %v3648_v41 = vpop.eup %3647  ;;  %v1416_v42 = vmul.f32 0.5, %v3646_v40 }
 0x72e   :  { %1424 = vrot.lane.b32.xlu0 %v3648_v41, %s3797_s10  ;;  %v3650_v45 = vpop.eup %3649 }
 0x72f   :  { %v1417_v43 = vadd.f32 0.5, %v1416_v42  ;;  %v1172_v46 = vmul.f32 0.5, %v3650_v45 }
 0x731   :  { %1431 = vrot.lane.b32.xlu1 %v1417_v43, %s3796_s1  ;;  %v1173_v48 = vadd.f32 0.5, %v1172_v46  ;;  %v2131_v46 = vld [vmem:[#allocation2] sm:$0xff] }
 0x79b   :  { %v1420_v47 = vpop.permute.xlu1 %1419 }
 0x79c   :  { %v1422_v50 = vmul.f32 %v1420_v47, %v3994_v14  ;;  %v2132_v47 = vld [vmem:[#allocation2 + $0x8] sm:$0xff] }
 0x7a0   :  { %v1425_v49 = vpop.permute.xlu0 %1424 }
 0x7a1   :  { %v1427_v51 = vmul.f32 %v1425_v49, %v1173_v48  ;;  %v2212_v48 = vld [vmem:[#allocation2 + $0x20] sm:$0xff]  ;;  %v4099_v49 = vpack.c.bf16 %v2132_v47, %v2131_v46 }
 0x7a3   :  { %v4033_v52 = vadd.f32 %v1427_v51, %v1422_v50  ;;  %v1432_v54 = vpop.permute.xlu1 %1431  ;;  %v2213_v50 = vld [vmem:[#allocation2 + $0x28] sm:$0xff] }
 0x7a4   :  { %v3560_v51 = vpack.c.bf16 %v2213_v50, %v2212_v48 }
 0x7a5   :  { %3651 = vtanh.f32 %v4033_v52 }
 0x7af   :  { %v3652_v53 = vpop.eup %3651 }
 0x7b0   :  { %v1434_v55 = vmul.f32 %v3652_v53, %v1432_v54  ;;  %v2134_v53 = vld [vmem:[#allocation2 + $0x18] sm:$0xff]  ;;  %v2214_v54 = vld [vmem:[#allocation2 + $0x30] sm:$0xff] }
 0x7b2   :  { %1436 = vst.msk [vmem:[#allocation9 + $0x18] sm:$0xff] %vm42_vm0, %v1434_v55  ;;  %3242 = vmatmul.mubr.msk.f32.vlgmr.msra.gmra.mrb[16].mxu0 %vm42_vm0, %v1434_v55  ;;  %3253 = vmatmul.mubr.msk.f32.vlgmr.msra.gmra.mrb[16].mxu1 %vm42_vm0, %v1434_v55 }
 0x7b3   :  { %3519 = vmatpush3.bf16.msra.mxu0 %v3871_v19  ;;  %3525 = vmatpush3.bf16.msra.mxu1 %v3876_v22 }
 0x7b4   :  { %3520 = vmatprep.subr.bf16.mxu0 %v3794_v1  ;;  %3526 = vmatprep.subr.bf16.mxu1 %v3794_v1 }
 0x7b5   :  { %3263 = vmatprep.mubr.msk.f32.mxu0 %vm3795_vm1, %v3793_v0  ;;  %3274 = vmatprep.mubr.msk.f32.mxu1 %vm3795_vm1, %v3793_v0 }
 0x7b7   :  { %3522 = vmatpush3.bf16.msra.mxu0 %v3881_v25  ;;  %3528 = vmatpush3.bf16.msra.mxu1 %v3887_v26 }
 0x7b8   :  { %3529 = vmatprep.subr.bf16.mxu0 %v3794_v1  ;;  %3535 = vmatprep.subr.bf16.mxu1 %v3794_v1 }
 0x7ba   :  { %3264 = vmatmul.mubr.msk.f32.vlgmr.msra.gmra.mrb[18].mxu0 %vm42_vm0, %v1434_v55  ;;  %3275 = vmatmul.mubr.msk.f32.vlgmr.msra.gmra.mrb[18].mxu1 %vm42_vm0, %v1434_v55 }
 0x7bb   :  { %3531 = vmatpush3.bf16.msra.mxu0 %v3858_v5  ;;  %3537 = vmatpush3.bf16.msra.mxu1 %v3860_v9 }
 0x7bc   :  { %3532 = vmatprep.subr.bf16.mxu0 %v3794_v1  ;;  %3538 = vmatprep.subr.bf16.mxu1 %v3794_v1 }
 0x7bd   :  { %3285 = vmatprep.mubr.msk.f32.mxu0 %vm3795_vm1, %v3793_v0  ;;  %3296 = vmatprep.mubr.msk.f32.mxu1 %vm3795_vm1, %v3793_v0 }
 0x7bf   :  { %3534 = vmatpush3.bf16.msra.mxu0 %v3863_v12  ;;  %3540 = vmatpush3.bf16.msra.mxu1 %v3867_v13 }
 0x7c0   :  { %3541 = vmatprep.subr.bf16.mxu0 %v3794_v1  ;;  %3547 = vmatprep.subr.bf16.mxu1 %v3794_v1 }
 0x885   :  { %v1512_v5 = vpop.f32.mrb[16].mxu0  ;;  %v1590_v9 = vpop.f32.mrb[16].mxu1 }
 0x886   :  { %1595 = vrot.lane.b32.xlu0 %v1590_v9, %s3796_s1  ;;  %v3243_v56 = vpop.f32.mrb[17].mxu0  ;;  %v3254_v57 = vpop.f32.mrb[17].mxu1  ;;  %v1516_v16 = vadd.f32 %v1512_v5, %v1438_v61  ;;  %v2215_v9 = vld [vmem:[#allocation2 + $0x38] sm:$0xff] }
 0x88d   :  { %v1672_v58 = vpop.f32.mrb[18].mxu0  ;;  %v1752_v59 = vpop.f32.mrb[18].mxu1 }
 0x88e   :  { %1757 = vrot.lane.b32.xlu0 %v1752_v59, %s3798_s11  ;;  %v3276_v60 = vpop.f32.mrb[19].mxu1  ;;  %1677 = vrot.lane.b32.xlu1 %v1672_v58, %s3797_s10  ;;  %v3265_v12 = vpop.f32.mrb[19].mxu0  ;;  %v3563_v58 = vpack.c.bf16 %v2215_v9, %v2214_v54 }
 0x8f8   :  { %v1596_v13 = vpop.permute.xlu0 %1595 }
 0x8f9   :  { %v1598_v62 = vadd.f32 %v1596_v13, %v1438_v61 }
 0x8fb   :  { %3653 = vtanh.f32 %v1598_v62 }
 0x900   :  { %v1758_v63 = vpop.permute.xlu0 %1757  ;;  %v1678_v2 = vpop.permute.xlu1 %1677 }
 0x901   :  { %v1760_v3 = vadd.f32 %v1758_v63, %v1438_v61  ;;  %v1680_v4 = vadd.f32 %v1678_v2, %v1438_v61 }
 0x903   :  { %3655 = vtanh.f32 %v1760_v3 }
 0x904   :  { %3657 = vtanh.f32 %v1680_v4 }
 0x905   :  { %v3654_v6 = vpop.eup %3653  ;;  %3659 = vtanh.f32 %v1516_v16 }
 0x906   :  { %v1600_v7 = vmul.f32 0.5, %v3654_v6  ;;  %v2294_v6 = vld [vmem:[#allocation2 + $0x40] sm:$0xff] }
 0x908   :  { %v1601_v8 = vadd.f32 0.5, %v1600_v7  ;;  %v2295_v7 = vld [vmem:[#allocation2 + $0x48] sm:$0xff] }
 0x90a   :  { %1765 = vrot.lane.b32.xlu1 %v1601_v8, %s3798_s11  ;;  %v2374_v8 = vld [vmem:[#allocation2 + $0x60] sm:$0xff] }
 0x90d   :  { %v3656_v10 = vpop.eup %3655 }
 0x90e   :  { %v3658_v11 = vpop.eup %3657  ;;  %v1762_v14 = vmul.f32 0.5, %v3656_v10  ;;  %v2375_v10 = vld [vmem:[#allocation2 + $0x68] sm:$0xff] }
 0x90f   :  { %1770 = vrot.lane.b32.xlu0 %v3658_v11, %s3797_s10  ;;  %v3660_v17 = vpop.eup %3659  ;;  %v4115_v16 = vpack.c.bf16 %v2375_v10, %v2374_v8 }
 0x910   :  { %v1763_v15 = vadd.f32 0.5, %v1762_v14  ;;  %v1518_v18 = vmul.f32 0.5, %v3660_v17  ;;  %v2296_v17 = vld [vmem:[#allocation2 + $0x50] sm:$0xff] }
 0x912   :  { %1777 = vrot.lane.b32.xlu1 %v1763_v15, %s3796_s1  ;;  %v1519_v21 = vadd.f32 0.5, %v1518_v18  ;;  %v4113_v15 = vpack.c.bf16 %v2295_v7, %v2294_v6 }
 0x97c   :  { %v1766_v20 = vpop.permute.xlu1 %1765 }
 0x97d   :  { %v1768_v24 = vmul.f32 %v1766_v20, %v4033_v52  ;;  %v2133_v52 = vld [vmem:[#allocation2 + $0x10] sm:$0xff]  ;;  %v2297_v20 = vld [vmem:[#allocation2 + $0x58] sm:$0xff] }
 0x97e   :  { %v3557_v5 = vpack.c.bf16 %v2134_v53, %v2133_v52 }
 0x981   :  { %v1771_v23 = vpop.permute.xlu0 %1770 }
 0x982   :  { %v1773_v27 = vmul.f32 %v1771_v23, %v1519_v21  ;;  %v2376_v21 = vld [vmem:[#allocation2 + $0x70] sm:$0xff]  ;;  %v2377_v23 = vld [vmem:[#allocation2 + $0x78] sm:$0xff] }
 0x984   :  { %v4072_v28 = vadd.f32 %v1773_v27, %v1768_v24  ;;  %v1778_v30 = vpop.permute.xlu1 %1777  ;;  %v4122_v24 = vpack.c.bf16 %v2297_v20, %v2296_v17  ;;  %v4124_v27 = vpack.c.bf16 %v2377_v23, %v2376_v21 }
 0x986   :  { %3661 = vtanh.f32 %v4072_v28 }
 0x990   :  { %v3662_v29 = vpop.eup %3661 }
 0x991   :  { %v1780_v31 = vmul.f32 %v3662_v29, %v1778_v30 }
 0x993   :  { %1782 = vst.msk [vmem:[#allocation9 + $0x20] sm:$0xff] %vm42_vm0, %v1780_v31  ;;  %3286 = vmatmul.mubr.msk.f32.vlgmr.msra.gmra.mrb[20].mxu0 %vm42_vm0, %v1780_v31  ;;  %3297 = vmatmul.mubr.msk.f32.vlgmr.msra.gmra.mrb[20].mxu1 %vm42_vm0, %v1780_v31 }
 0x994   :  { %3543 = vmatpush3.bf16.msra.mxu0 %v3871_v19  ;;  %3549 = vmatpush3.bf16.msra.mxu1 %v3876_v22 }
 0x995   :  { %3544 = vmatprep.subr.bf16.mxu0 %v3794_v1  ;;  %3550 = vmatprep.subr.bf16.mxu1 %v3794_v1 }
 0x996   :  { %3307 = vmatprep.mubr.msk.f32.mxu0 %vm3795_vm1, %v3793_v0  ;;  %3318 = vmatprep.mubr.msk.f32.mxu1 %vm3795_vm1, %v3793_v0 }
 0x998   :  { %3546 = vmatpush3.bf16.msra.mxu0 %v3881_v25  ;;  %3552 = vmatpush3.bf16.msra.mxu1 %v3887_v26 }
 0x999   :  { %3553 = vmatprep.subr.bf16.mxu0 %v3794_v1  ;;  %3559 = vmatprep.subr.bf16.mxu1 %v3794_v1 }
 0x99b   :  { %3308 = vmatmul.mubr.msk.f32.vlgmr.msra.gmra.mrb[22].mxu0 %vm42_vm0, %v1780_v31  ;;  %3319 = vmatmul.mubr.msk.f32.vlgmr.msra.gmra.mrb[22].mxu1 %vm42_vm0, %v1780_v31 }
 0x99c   :  { %3329 = vmatprep.mubr.msk.f32.mxu0 %vm3795_vm1, %v3793_v0  ;;  %3340 = vmatprep.mubr.msk.f32.mxu1 %vm3795_vm1, %v3793_v0 }
 0x99d   :  { %3555 = vmatpush3.bf16.msra.mxu0 %v4099_v49  ;;  %3561 = vmatpush3.bf16.msra.mxu1 %v3560_v51 }
 0x99e   :  { %3556 = vmatprep.subr.bf16.mxu0 %v3794_v1  ;;  %3562 = vmatprep.subr.bf16.mxu1 %v3794_v1 }
 0x9a1   :  { %3558 = vmatpush3.bf16.msra.mxu0 %v3557_v5  ;;  %3564 = vmatpush3.bf16.msra.mxu1 %v3563_v58 }
 0x9a2   :  { %3565 = vmatprep.subr.bf16.mxu0 %v3794_v1  ;;  %3571 = vmatprep.subr.bf16.mxu1 %v3794_v1 }
 0xa66   :  { %v1858_v19 = vpop.f32.mrb[20].mxu0  ;;  %v1936_v22 = vpop.f32.mrb[20].mxu1 }
 0xa67   :  { %1941 = vrot.lane.b32.xlu0 %v1936_v22, %s3796_s1  ;;  %v3287_v25 = vpop.f32.mrb[21].mxu0  ;;  %v3298_v26 = vpop.f32.mrb[21].mxu1  ;;  %v1862_v60 = vadd.f32 %v1858_v19, %v1784_v36 }
 0xa6e   :  { %v2018_v32 = vpop.f32.mrb[22].mxu0  ;;  %v2098_v33 = vpop.f32.mrb[22].mxu1 }
 0xa6f   :  { %2103 = vrot.lane.b32.xlu0 %v2098_v33, %s3798_s11  ;;  %v3320_v34 = vpop.f32.mrb[23].mxu1  ;;  %2023 = vrot.lane.b32.xlu1 %v2018_v32, %s3797_s10  ;;  %v3309_v35 = vpop.f32.mrb[23].mxu0  ;;  %v2130_v32 = vld [vmem:[#allocation6 + $0x30] sm:$0xff] }
 0xad9   :  { %v1942_v37 = vpop.permute.xlu0 %1941 }
 0xada   :  { %v1944_v38 = vadd.f32 %v1942_v37, %v1784_v36 }
 0xadc   :  { %3663 = vtanh.f32 %v1944_v38 }
 0xae1   :  { %v2104_v39 = vpop.permute.xlu0 %2103  ;;  %v2024_v40 = vpop.permute.xlu1 %2023 }
 0xae2   :  { %v2106_v41 = vadd.f32 %v2104_v39, %v1784_v36  ;;  %v2026_v42 = vadd.f32 %v2024_v40, %v1784_v36 }
 0xae4   :  { %3665 = vtanh.f32 %v2106_v41 }
 0xae5   :  { %3667 = vtanh.f32 %v2026_v42 }
 0xae6   :  { %v3664_v43 = vpop.eup %3663  ;;  %3669 = vtanh.f32 %v1862_v60 }
 0xae7   :  { %v1946_v44 = vmul.f32 0.5, %v3664_v43 }
 0xae9   :  { %v1947_v45 = vadd.f32 0.5, %v1946_v44 }
 0xaeb   :  { %2111 = vrot.lane.b32.xlu1 %v1947_v45, %s3798_s11 }
 0xaee   :  { %v3666_v55 = vpop.eup %3665 }
 0xaef   :  { %v3668_v56 = vpop.eup %3667  ;;  %v2108_v57 = vmul.f32 0.5, %v3666_v55 }
 0xaf0   :  { %2116 = vrot.lane.b32.xlu0 %v3668_v56, %s3797_s10  ;;  %v3670_v12 = vpop.eup %3669 }
 0xaf1   :  { %v2109_v59 = vadd.f32 0.5, %v2108_v57  ;;  %v1864_v61 = vmul.f32 0.5, %v3670_v12 }
 0xaf3   :  { %2123 = vrot.lane.b32.xlu1 %v2109_v59, %s3796_s1  ;;  %v1865_v62 = vadd.f32 0.5, %v1864_v61  ;;  %v2476_v61 = vld [vmem:[#allocation6 + $0x38] sm:$0xff] }
 0xb5d   :  { %v2112_v13 = vpop.permute.xlu1 %2111 }
 0xb5e   :  { %v2114_v2 = vmul.f32 %v2112_v13, %v4072_v28 }
 0xb62   :  { %v2117_v63 = vpop.permute.xlu0 %2116 }
 0xb63   :  { %v2119_v3 = vmul.f32 %v2117_v63, %v1865_v62 }
 0xb65   :  { %v4110_v4 = vadd.f32 %v2119_v3, %v2114_v2  ;;  %v2124_v14 = vpop.permute.xlu1 %2123 }
 0xb67   :  { %3671 = vtanh.f32 %v4110_v4 }
 0xb71   :  { %v3672_v11 = vpop.eup %3671 }
 0xb72   :  { %v2126_v18 = vmul.f32 %v3672_v11, %v2124_v14 }
 0xb74   :  { %2128 = vst.msk [vmem:[#allocation9 + $0x28] sm:$0xff] %vm42_vm0, %v2126_v18  ;;  %3330 = vmatmul.mubr.msk.f32.vlgmr.msra.gmra.mrb[24].mxu0 %vm42_vm0, %v2126_v18  ;;  %3341 = vmatmul.mubr.msk.f32.vlgmr.msra.gmra.mrb[24].mxu1 %vm42_vm0, %v2126_v18 }
 0xb75   :  { %3567 = vmatpush3.bf16.msra.mxu0 %v4113_v15  ;;  %3573 = vmatpush3.bf16.msra.mxu1 %v4115_v16 }
 0xb76   :  { %3568 = vmatprep.subr.bf16.mxu0 %v3794_v1  ;;  %3574 = vmatprep.subr.bf16.mxu1 %v3794_v1 }
 0xb77   :  { %3351 = vmatprep.mubr.msk.f32.mxu0 %vm3795_vm1, %v3793_v0  ;;  %3362 = vmatprep.mubr.msk.f32.mxu1 %vm3795_vm1, %v3793_v0 }
 0xb79   :  { %3570 = vmatpush3.bf16.msra.mxu0 %v4122_v24  ;;  %3576 = vmatpush3.bf16.msra.mxu1 %v4124_v27 }
 0xb7a   :  { %3577 = vmatprep.subr.bf16.mxu0 %v3794_v1  ;;  %3583 = vmatprep.subr.bf16.mxu1 %v3794_v1 }
 0xb7c   :  { %3352 = vmatmul.mubr.msk.f32.vlgmr.msra.gmra.mrb[26].mxu0 %vm42_vm0, %v2126_v18  ;;  %3363 = vmatmul.mubr.msk.f32.vlgmr.msra.gmra.mrb[26].mxu1 %vm42_vm0, %v2126_v18 }
 0xb7d   :  { %3579 = vmatpush3.bf16.msra.mxu0 %v4099_v49  ;;  %3585 = vmatpush3.bf16.msra.mxu1 %v3560_v51 }
 0xb7e   :  { %3580 = vmatprep.subr.bf16.mxu0 %v3794_v1  ;;  %3586 = vmatprep.subr.bf16.mxu1 %v3794_v1 }
 0xb7f   :  { %3373 = vmatprep.mubr.msk.f32.mxu0 %vm3795_vm1, %v3793_v0  ;;  %3384 = vmatprep.mubr.msk.f32.mxu1 %vm3795_vm1, %v3793_v0 }
 0xb81   :  { %3582 = vmatpush3.bf16.msra.mxu0 %v3557_v5  ;;  %3588 = vmatpush3.bf16.msra.mxu1 %v3563_v58 }
 0xb82   :  { %3589 = vmatprep.subr.bf16.mxu0 %v3794_v1  ;;  %3595 = vmatprep.subr.bf16.mxu1 %v3794_v1 }
 0xc47   :  { %v2204_v28 = vpop.f32.mrb[24].mxu0  ;;  %v2282_v29 = vpop.f32.mrb[24].mxu1 }
 0xc48   :  { %2287 = vrot.lane.b32.xlu0 %v2282_v29, %s3796_s1  ;;  %v3331_v30 = vpop.f32.mrb[25].mxu0  ;;  %v3342_v31 = vpop.f32.mrb[25].mxu1  ;;  %v2208_v46 = vadd.f32 %v2204_v28, %v2130_v32 }
 0xc4f   :  { %v2364_v19 = vpop.f32.mrb[26].mxu0  ;;  %v2444_v22 = vpop.f32.mrb[26].mxu1 }
 0xc50   :  { %2449 = vrot.lane.b32.xlu0 %v2444_v22, %s3798_s11  ;;  %v3364_v25 = vpop.f32.mrb[27].mxu1  ;;  %2369 = vrot.lane.b32.xlu1 %v2364_v19, %s3797_s10  ;;  %v3353_v26 = vpop.f32.mrb[27].mxu0 }
 0xcba   :  { %v2288_v33 = vpop.permute.xlu0 %2287 }
 0xcbb   :  { %v2290_v34 = vadd.f32 %v2288_v33, %v2130_v32 }
 0xcbd   :  { %3673 = vtanh.f32 %v2290_v34 }
 0xcc2   :  { %v2450_v35 = vpop.permute.xlu0 %2449  ;;  %v2370_v36 = vpop.permute.xlu1 %2369 }
 0xcc3   :  { %v2452_v37 = vadd.f32 %v2450_v35, %v2130_v32  ;;  %v2372_v38 = vadd.f32 %v2370_v36, %v2130_v32 }
 0xcc5   :  { %3675 = vtanh.f32 %v2452_v37 }
 0xcc6   :  { %3677 = vtanh.f32 %v2372_v38 }
 0xcc7   :  { %v3674_v39 = vpop.eup %3673  ;;  %3679 = vtanh.f32 %v2208_v46 }
 0xcc8   :  { %v2292_v40 = vmul.f32 0.5, %v3674_v39 }
 0xcca   :  { %v2293_v41 = vadd.f32 0.5, %v2292_v40 }
 0xccc   :  { %2457 = vrot.lane.b32.xlu1 %v2293_v41, %s3798_s11 }
 0xccf   :  { %v3676_v42 = vpop.eup %3675 }
 0xcd0   :  { %v3678_v43 = vpop.eup %3677  ;;  %v2454_v44 = vmul.f32 0.5, %v3676_v42 }
 0xcd1   :  { %2462 = vrot.lane.b32.xlu0 %v3678_v43, %s3797_s10  ;;  %v3680_v47 = vpop.eup %3679 }
 0xcd2   :  { %v2455_v45 = vadd.f32 0.5, %v2454_v44  ;;  %v2210_v48 = vmul.f32 0.5, %v3680_v47 }
 0xcd4   :  { %2469 = vrot.lane.b32.xlu1 %v2455_v45, %s3796_s1  ;;  %v2211_v50 = vadd.f32 0.5, %v2210_v48 }
 0xd3e   :  { %v2458_v49 = vpop.permute.xlu1 %2457 }
 0xd3f   :  { %v2460_v52 = vmul.f32 %v2458_v49, %v4110_v4 }
 0xd43   :  { %v2463_v51 = vpop.permute.xlu0 %2462 }
 0xd44   :  { %v2465_v53 = vmul.f32 %v2463_v51, %v2211_v50 }
 0xd46   :  { %v2466_v54 = vadd.f32 %v2465_v53, %v2460_v52  ;;  %v2470_v5 = vpop.permute.xlu1 %2469 }
 0xd48   :  { %3681 = vtanh.f32 %v2466_v54 }
 0xd52   :  { %v3682_v55 = vpop.eup %3681 }
 0xd53   :  { %v2472_v9 = vmul.f32 %v3682_v55, %v2470_v5 }
 0xd55   :  { %2474 = vst.msk [vmem:[#allocation9 + $0x30] sm:$0xff] %vm42_vm0, %v2472_v9  ;;  %3374 = vmatmul.mubr.msk.f32.vlgmr.msra.gmra.mrb[28].mxu0 %vm42_vm0, %v2472_v9  ;;  %3385 = vmatmul.mubr.msk.f32.vlgmr.msra.gmra.mrb[28].mxu1 %vm42_vm0, %v2472_v9 }
 0xd56   :  { %3591 = vmatpush3.bf16.msra.mxu0 %v4113_v15  ;;  %3597 = vmatpush3.bf16.msra.mxu1 %v4115_v16 }
 0xd57   :  { %3592 = vmatprep.subr.bf16.mxu0 %v3794_v1  ;;  %3598 = vmatprep.subr.bf16.mxu1 %v3794_v1 }
 0xd58   :  { %3395 = vmatprep.mubr.msk.f32.mxu0 %vm3795_vm1, %v3793_v0  ;;  %3406 = vmatprep.mubr.msk.f32.mxu1 %vm3795_vm1, %v3793_v0 }
 0xd5a   :  { %3594 = vmatpush3.bf16.msra.mxu0 %v4122_v24  ;;  %3600 = vmatpush3.bf16.msra.mxu1 %v4124_v27 }
 0xd5d   :  { %3396 = vmatmul.mubr.msk.f32.vlgmr.msra.gmra.mrb[30].mxu0 %vm42_vm0, %v2472_v9  ;;  %3407 = vmatmul.mubr.msk.f32.vlgmr.msra.gmra.mrb[30].mxu1 %vm42_vm0, %v2472_v9 }
 0xe28   :  { %v2550_v56 = vpop.f32.mrb[28].mxu0  ;;  %v2628_v57 = vpop.f32.mrb[28].mxu1 }
 0xe29   :  { %2633 = vrot.lane.b32.xlu0 %v2628_v57, %s3796_s1  ;;  %v3375_v58 = vpop.f32.mrb[29].mxu0  ;;  %v3386_v1 = vpop.f32.mrb[29].mxu1  ;;  %v2554_v16 = vadd.f32 %v2550_v56, %v2476_v61 }
 0xe30   :  { %v2710_v59 = vpop.f32.mrb[30].mxu0  ;;  %v2790_v60 = vpop.f32.mrb[30].mxu1 }
 0xe31   :  { %2795 = vrot.lane.b32.xlu0 %v2790_v60, %s3798_s11  ;;  %v3408_v12 = vpop.f32.mrb[31].mxu1  ;;  %2715 = vrot.lane.b32.xlu1 %v2710_v59, %s3797_s10  ;;  %v3397_v0 = vpop.f32.mrb[31].mxu0 }
 0xe9b   :  { %v2634_v13 = vpop.permute.xlu0 %2633 }
 0xe9c   :  { %v2636_v62 = vadd.f32 %v2634_v13, %v2476_v61 }
 0xe9e   :  { %3683 = vtanh.f32 %v2636_v62 }
 0xea3   :  { %v2796_v63 = vpop.permute.xlu0 %2795  ;;  %v2716_v2 = vpop.permute.xlu1 %2715 }
 0xea4   :  { %v2798_v3 = vadd.f32 %v2796_v63, %v2476_v61  ;;  %v2718_v4 = vadd.f32 %v2716_v2, %v2476_v61 }
 0xea6   :  { %3685 = vtanh.f32 %v2798_v3 }
 0xea7   :  { %3687 = vtanh.f32 %v2718_v4 }
 0xea8   :  { %v3684_v6 = vpop.eup %3683  ;;  %3689 = vtanh.f32 %v2554_v16 }
 0xea9   :  { %v2638_v7 = vmul.f32 0.5, %v3684_v6 }
 0xeab   :  { %v2639_v8 = vadd.f32 0.5, %v2638_v7 }
 0xead   :  { %2803 = vrot.lane.b32.xlu1 %v2639_v8, %s3798_s11 }
 0xeb0   :  { %v3686_v10 = vpop.eup %3685 }
 0xeb1   :  { %v3688_v11 = vpop.eup %3687  ;;  %v2800_v14 = vmul.f32 0.5, %v3686_v10 }
 0xeb2   :  { %2808 = vrot.lane.b32.xlu0 %v3688_v11, %s3797_s10  ;;  %v3690_v17 = vpop.eup %3689 }
 0xeb3   :  { %v2801_v15 = vadd.f32 0.5, %v2800_v14  ;;  %v2556_v18 = vmul.f32 0.5, %v3690_v17 }
 0xeb5   :  { %2815 = vrot.lane.b32.xlu1 %v2801_v15, %s3796_s1  ;;  %v2557_v21 = vadd.f32 0.5, %v2556_v18 }
 0xf1f   :  { %v2804_v20 = vpop.permute.xlu1 %2803 }
 0xf20   :  { %v2806_v24 = vmul.f32 %v2804_v20, %v2466_v54 }
 0xf24   :  { %v2809_v23 = vpop.permute.xlu0 %2808 }
 0xf25   :  { %v2811_v27 = vmul.f32 %v2809_v23, %v2557_v21 }
 0xf27   :  { %v2812_v28 = vadd.f32 %v2811_v27, %v2806_v24 }
 0xf29   :  { %3691 = vtanh.f32 %v2812_v28  ;;  %2822 = vst.msk [vmem:[#allocation4] sm:$0xff] %vm42_vm0, %v2812_v28  ;;  %2826 = vst.msk [vmem:[#allocation10] sm:$0xff] %vm42_vm0, %v2812_v28 }
 0xf2a   :  { %3748 = shalt.err (!%p3745_p6)
}
 0xf2b   :  { %s3749_s17 = scalar_lea.hbm %s4209_s3, 128 }
 0xf2c   :  { %p3750_p7 = scmp.ne.s32.totalorder %s4209_s3, %s3749_s17  ;;  %p3753_p8 = scmp.lt.u32.totalorder %s3749_s17, %s4209_s3 }
 0xf2e   :  { %p3755_p9 = pnand %p3753_p8, %p3750_p7 }
 0xf30   :  { %3758 = shalt.err (!%p3755_p9)
}
 0xf31   :  { %2848 = dma.vmem_to_hbm [thread:$0]  %s2846_s13, 128, %s4209_s3, [#allocation11]   ;;  %v2816_v30 = vpop.permute.xlu1 %2815 }
 0xf32   :  { %s3800_s26 = smov [#allocation9]  }
 0xf33   :  { %s2832_s27 = sshll.u32 %s3800_s26, 4  ;;  %v3692_v29 = vpop.eup %3691  ;;  %s2833_s27 = int_to_ptr.vmem [resolvable:$true] %s2832_s27 }
 0xf34   :  { %v2818_v31 = vmul.f32 %v3692_v29, %v2816_v30  ;;  %s3759_s28 = scalar_lea.vmem %s2833_s27, 1024  ;;  %p3764_p11 = scmp.lt.s32.totalorder %s2833_s27, %s2833_s27 }
 0xf35   :  { %p3760_p10 = scmp.ne.s32.totalorder %s2833_s27, %s3759_s28  ;;  %p3765_p12 = scmp.lt.s32.totalorder %s3759_s28, %s3759_s28 }
 0xf36   :  { %2820 = vst.msk [vmem:[#allocation9 + $0x38] sm:$0xff] %vm42_vm0, %v2818_v31  ;;  %2821 = vst.msk [vmem:[#allocation3] sm:$0xff] %vm42_vm0, %v2818_v31 }
 0xf37   :  { %p3766_p13 = por %p3765_p12, %p3764_p11 }
 0xf39   :  { %p3767_p0 = pnand %p3766_p13, %p3760_p10 }
 0xf3b   :  { %3770 = shalt.err (!%p3767_p0)
}
 0xf3c   :  { %s3771_s3 = scalar_lea.hbm %s4208_s2, 1024 }
 0xf3d   :  { %p3772_p1 = scmp.ne.s32.totalorder %s4208_s2, %s3771_s3  ;;  %p3775_p2 = scmp.lt.u32.totalorder %s3771_s3, %s4208_s2 }
 0xf3f   :  { %p3777_p3 = pnand %p3775_p2, %p3772_p1 }
 0xf41   :  { %3780 = shalt.err (!%p3777_p3)
}
 0xf42   :  { %2838 = dma.vmem_to_hbm [thread:$0]  %s2833_s27, 1024, %s4208_s2, [#allocation8], %s3790_s22, %s3790_s22, %s3791_s23  }
 0xf43   :  { %3785 = dma.done.wait [#allocation8], 1024  }
 0xf44   :  { %3786 = vsyncadd [#allocation8], 4294966272 }
 0xf45   :  { %3787 = dma.done.wait [#allocation11], 128  }
 0xf46   :  { %3788 = vsyncadd [#allocation11], 4294967168 }
 0xf47   :  { %2855 = vsyncpa [#allocation7], 1 }
 0xf48   :  { %2856 = vsyncpa [#allocation8], 1 }
 0xf49   :  { %2857 = vsyncpa [#allocation11], 1 }
 0xf4a   :  { %2858 = vsyncmov [#allocation5] }
 0xf4d   :  { %s2859_s9 = vpop.sfrf %2858 }
 0xf4e   :  { %p2896_p4 = scmp.ne.s32.totalorder %s2859_s9, 0 }
 0xf50   :  { %2863 = shalt.err (%p2896_p4)  }

</bundles_post_ra>
